<compile_context>
chip_gen: v7x
topology: tpu7x:2x2x1
jax: 0.10.0
libtpu: 0.0.40
codegen_flags: <defaults>
</compile_context>

<pallas_src>
import functools
import math

import jax
import jax.numpy as jnp
from jax.experimental import pallas as pl
from jax.experimental.pallas import tpu as pltpu

# ----------------------------- model hyper-params ---------------------------
B = 2            # batch
S = 8            # sequence length (sub-word tokens)
H = 32           # hidden size
N_HEADS = 4
D_HEAD = H // N_HEADS
FF = 4 * H
N_LAYERS = 2
VOCAB = 50
NUM_TAG = 5      # tag head -> NUM_TAG - 1 outputs, decision head -> 2 outputs
TAG_DIM = NUM_TAG - 1
DEC_DIM = 2
MASK_LANE = TAG_DIM + DEC_DIM   # lane of the output slab carrying mask_larger
HEAD_PAD = 128                  # lane-dense output slab width
TILDE_ID = 5     # synthetic id for '~</w>'
APOS_ID = 7      # synthetic id for "'</w>"
BOS_ID = 0       # '<s>'
EOS_ID = 1       # '</s>'
LN_EPS = 1e-12
ATTN_SCALE = 1.0 / math.sqrt(D_HEAD)


# ------------------------------ fused Pallas kernel --------------------------
def _layer_norm(x, gb):
    """LayerNorm over the last dim. x:(M,H), gb:(2,H) = [gamma; beta]."""
    g = gb[0:1, :]
    b = gb[1:2, :]
    mu = jnp.mean(x, axis=-1, keepdims=True)
    var = jnp.mean(jnp.square(x - mu), axis=-1, keepdims=True)
    return (x - mu) * jax.lax.rsqrt(var + LN_EPS) * g + b


def _gec_fused_kernel(
    ids_ref,        # (B*S, 1) int32 token ids
    mask_row_ref,   # (B, 1, S) f32 attention mask (token axis on lanes)
    mask_col_ref,   # (B*S, 1) f32 attention mask (token axis on sublanes)
    wi_ref,         # (B, 1, S) int32 word index
    word_emb_ref,   # (VOCAB, H)
    pos_emb_ref,    # (B*S, H) pre-tiled position embeddings
    ln_emb_ref,     # (2, H)
    qkv_w_ref,      # (L, H, 3H)  fused [Wq | Wk | Wv]
    qkv_b_ref,      # (L, 1, 3H)
    o_w_ref,        # (L, H, H)
    o_b_ref,        # (L, 1, H)
    ln1_ref,        # (L, 2, H)
    ff1_w_ref,      # (L, H, FF)
    ff1_b_ref,      # (L, 1, FF)
    ff2_w_ref,      # (L, FF, H)
    ff2_b_ref,      # (L, 1, H)
    ln2_ref,        # (L, 2, H)
    head_w_ref,     # (H, HEAD_PAD)  [tag | decision | zero pad]
    head_b_ref,     # (1, HEAD_PAD)
    out_ref,        # (B, S, HEAD_PAD) lane-dense output slab
    *, batch, seq,
):
    n_tok = batch * seq
    mask_row = mask_row_ref[...]                       # (B, 1, S)
    mask_col = mask_col_ref[...]                       # (B*S, 1)
    mask_bias = (1.0 - mask_row) * -1e9                # additive attn bias

    # --- embeddings: gather as a one-hot matmul so it stays on the MXU ---
    vocab_iota = jax.lax.broadcasted_iota(jnp.int32, (n_tok, VOCAB), 1)
    onehot_ids = (ids_ref[...] == vocab_iota).astype(jnp.float32)
    x = jnp.dot(onehot_ids, word_emb_ref[...], preferred_element_type=jnp.float32)
    x = x + pos_emb_ref[...]
    x = _layer_norm(x, ln_emb_ref[...])
    x = x * mask_col                                   # XLM-style padding mask

    # --- transformer layers (statically unrolled; weights VMEM-resident) ---
    for l in range(N_LAYERS):
        qkv = jnp.dot(x, qkv_w_ref[l], preferred_element_type=jnp.float32)
        qkv = qkv + qkv_b_ref[l]                       # (B*S, 3H)
        o_w = o_w_ref[l]
        attn_out = jnp.zeros((n_tok, H), jnp.float32)
        for h in range(N_HEADS):
            lo = h * D_HEAD
            qh = qkv[:, lo:lo + D_HEAD].reshape(batch, seq, D_HEAD)
            kh = qkv[:, H + lo:H + lo + D_HEAD].reshape(batch, seq, D_HEAD)
            vh = qkv[:, 2 * H + lo:2 * H + lo + D_HEAD].reshape(batch, seq, D_HEAD)
            s = jnp.einsum('bqd,bkd->bqk', qh, kh,
                           preferred_element_type=jnp.float32) * ATTN_SCALE
            s = s + mask_bias
            s = s - jnp.max(s, axis=-1, keepdims=True)
            e = jnp.exp(s)
            p = e * pl.reciprocal(jnp.sum(e, axis=-1, keepdims=True), approx=True)
            ctx = jnp.einsum('bqk,bkd->bqd', p, vh,
                             preferred_element_type=jnp.float32)
            # Fold the per-head slice of the output projection in as an
            # accumulation (avoids a lane concat of the heads).
            attn_out = attn_out + jnp.dot(ctx.reshape(n_tok, D_HEAD),
                                          o_w[lo:lo + D_HEAD, :],
                                          preferred_element_type=jnp.float32)
        attn_out = attn_out + o_b_ref[l]
        x = _layer_norm(x + attn_out, ln1_ref[l])

        ff = jnp.dot(x, ff1_w_ref[l], preferred_element_type=jnp.float32)
        ff = ff + ff1_b_ref[l]
        # TODO(synk): FlauBERT uses the exact erf GELU; the tanh approximation
        # is used here for a guaranteed in-kernel (EUP) lowering.
        ff = jax.nn.gelu(ff, approximate=True)
        ff = jnp.dot(ff, ff2_w_ref[l], preferred_element_type=jnp.float32)
        ff = ff + ff2_b_ref[l]
        x = _layer_norm(x + ff, ln2_ref[l])
        x = x * mask_col                               # XLM-style padding mask

    # --- word_collate: segment mean of hidden states, segment max of mask ---
    word_iota = jax.lax.broadcasted_iota(jnp.int32, (batch, seq, seq), 1)
    onehot_w = (wi_ref[...] == word_iota).astype(jnp.float32)   # (B, word, tok)
    sums = jax.lax.dot_general(onehot_w, x.reshape(batch, seq, H),
                               (((2,), (1,)), ((0,), (0,))),
                               preferred_element_type=jnp.float32)
    counts = jnp.sum(onehot_w, axis=-1, keepdims=True)
    h_w = sums / jnp.maximum(counts, 1.0)                       # (B, S, H)
    mask_larger = jnp.max(onehot_w * mask_row, axis=-1, keepdims=True)  # (B,S,1)

    # --- merged tag+decision heads -> one lane-dense 128-wide output slab ---
    head = jnp.dot(h_w.reshape(n_tok, H), head_w_ref[...],
                   preferred_element_type=jnp.float32) + head_b_ref[...]
    head = head.reshape(batch, seq, HEAD_PAD)
    lane = jax.lax.broadcasted_iota(jnp.int32, (batch, seq, HEAD_PAD), 2)
    head = head + jnp.where(lane == MASK_LANE, mask_larger, 0.0)
    out_ref[...] = head


# ---------------------------- parameter creation -----------------------------
def init_params(key):
    keys = iter(jax.random.split(key, 16))
    std = 0.02

    def w(shape):
        return (std * jax.random.normal(next(keys), shape)).astype(jnp.float32)

    def zeros(shape):
        return jnp.zeros(shape, jnp.float32)

    def gamma_beta(n):
        return jnp.stack([jnp.ones((n,), jnp.float32), jnp.zeros((n,), jnp.float32)])

    tag_w = w((H, TAG_DIM))
    dec_w = w((H, DEC_DIM))
    head_w = jnp.zeros((H, HEAD_PAD), jnp.float32)
    head_w = head_w.at[:, :TAG_DIM].set(tag_w)
    head_w = head_w.at[:, TAG_DIM:TAG_DIM + DEC_DIM].set(dec_w)

    return {
        "word_emb": w((VOCAB, H)),
        "pos_emb": w((S, H)),
        "ln_emb": gamma_beta(H),                                    # (2, H)
        "qkv_w": w((N_LAYERS, H, 3 * H)),
        "qkv_b": zeros((N_LAYERS, 1, 3 * H)),
        "o_w": w((N_LAYERS, H, H)),
        "o_b": zeros((N_LAYERS, 1, H)),
        "ln1": jnp.stack([gamma_beta(H)] * N_LAYERS),               # (L, 2, H)
        "ff1_w": w((N_LAYERS, H, FF)),
        "ff1_b": zeros((N_LAYERS, 1, FF)),
        "ff2_w": w((N_LAYERS, FF, H)),
        "ff2_b": zeros((N_LAYERS, 1, H)),
        "ln2": jnp.stack([gamma_beta(H)] * N_LAYERS),
        "head_w": head_w,                                           # (H, 128)
        "head_b": zeros((1, HEAD_PAD)),
    }


# --------------------------- word-index generation ---------------------------
# TODO(synk): tokenizer._convert_id_to_token string checks ('</w>', '<s>',
# '</s>') are replaced by a deterministic synthetic id->is_end_of_word table.
IS_EOW_TABLE = ((jnp.arange(VOCAB) % 3 == 0)
                | (jnp.arange(VOCAB) == EOS_ID)
                | (jnp.arange(VOCAB) == TILDE_ID)
                | (jnp.arange(VOCAB) == APOS_ID))


def generate_word_index(input_ids):
    we = IS_EOW_TABLE[input_ids].astype(jnp.int32)
    tildes = input_ids == TILDE_ID
    comb = tildes[:, 1:-1] | tildes[:, 2:] | tildes[:, :-2]
    we = we.at[:, 1:-1].set(jnp.where(comb, 0, we[:, 1:-1]))
    alone_apos = (input_ids == APOS_ID)[:, 1:]
    we = we.at[:, :-1].set(jnp.where(alone_apos, 0, we[:, :-1]))
    we = jnp.roll(we, 1, axis=-1)
    we = we.at[:, 0].set(0)
    return jnp.cumsum(we, axis=-1)


# --------------------------------- forward -----------------------------------
def gec_bert_2decisions_forward(params, input_ids, attention_mask):
    Bi, Si = input_ids.shape
    n_tok = Bi * Si
    word_index = generate_word_index(input_ids).astype(jnp.int32)
    maskf = attention_mask.astype(jnp.float32)

    kernel = functools.partial(_gec_fused_kernel, batch=Bi, seq=Si)
    slab = pl.pallas_call(
        kernel,
        out_shape=jax.ShapeDtypeStruct((Bi, Si, HEAD_PAD), jnp.float32),
    )(
        input_ids.astype(jnp.int32).reshape(n_tok, 1),
        maskf.reshape(Bi, 1, Si),
        maskf.reshape(n_tok, 1),
        word_index.reshape(Bi, 1, Si),
        params["word_emb"],
        jnp.tile(params["pos_emb"], (Bi, 1)),          # (B*S, H)
        params["ln_emb"],
        params["qkv_w"], params["qkv_b"],
        params["o_w"], params["o_b"], params["ln1"],
        params["ff1_w"], params["ff1_b"],
        params["ff2_w"], params["ff2_b"], params["ln2"],
        params["head_w"], params["head_b"],
    )

    tag_out = slab[:, :, :TAG_DIM]
    decision_out = slab[:, :, TAG_DIM:TAG_DIM + DEC_DIM]
    mask_larger = slab[:, :, MASK_LANE]
    att_mask = jnp.zeros_like(mask_larger)
    att_mask = att_mask.at[:, 1:-1].set(mask_larger[:, 2:])
    # dropout p = 0.0 -> dropout layers are None in the reference -> identity
    return {"tag_out": tag_out, "decision_out": decision_out,
            "attention_mask": att_mask}


# ----------------------------------- main -------------------------------------
if __name__ == "__main__":
    key = jax.random.PRNGKey(0)
    pkey, ikey = jax.random.split(key)
    params = init_params(pkey)

    input_ids = jax.random.randint(ikey, (B, S), 2, VOCAB, dtype=jnp.int32)
    input_ids = input_ids.at[:, 0].set(BOS_ID).at[:, -1].set(EOS_ID)
    attention_mask = jnp.ones((B, S), jnp.int32).at[1, -2:].set(0)

    fwd = jax.jit(gec_bert_2decisions_forward)
    out = fwd(params, input_ids, attention_mask)
    jax.block_until_ready(out)

    assert out["tag_out"].shape == (B, S, TAG_DIM)
    assert out["decision_out"].shape == (B, S, DEC_DIM)
    assert out["attention_mask"].shape == (B, S)
    print("KERNEL_OK")
</pallas_src>

<mosaic_0001>
module attributes {stable_mosaic.version = 11 : i64} {
  func.func @_gec_fused_kernel(%arg0: memref<16x1xi32, #tpu.memory_space<vmem>>, %arg1: memref<2x1x8xf32, #tpu.memory_space<vmem>>, %arg2: memref<16x1xf32, #tpu.memory_space<vmem>>, %arg3: memref<2x1x8xi32, #tpu.memory_space<vmem>>, %arg4: memref<50x32xf32, #tpu.memory_space<vmem>>, %arg5: memref<16x32xf32, #tpu.memory_space<vmem>>, %arg6: memref<2x32xf32, #tpu.memory_space<vmem>>, %arg7: memref<2x32x96xf32, #tpu.memory_space<vmem>>, %arg8: memref<2x1x96xf32, #tpu.memory_space<vmem>>, %arg9: memref<2x32x32xf32, #tpu.memory_space<vmem>>, %arg10: memref<2x1x32xf32, #tpu.memory_space<vmem>>, %arg11: memref<2x2x32xf32, #tpu.memory_space<vmem>>, %arg12: memref<2x32x128xf32, #tpu.memory_space<vmem>>, %arg13: memref<2x1x128xf32, #tpu.memory_space<vmem>>, %arg14: memref<2x128x32xf32, #tpu.memory_space<vmem>>, %arg15: memref<2x1x32xf32, #tpu.memory_space<vmem>>, %arg16: memref<2x2x32xf32, #tpu.memory_space<vmem>>, %arg17: memref<32x128xf32, #tpu.memory_space<vmem>>, %arg18: memref<1x128xf32, #tpu.memory_space<vmem>>, %arg19: memref<2x8x128xf32, #tpu.memory_space<vmem>>) attributes {dimension_semantics = [], scalar_prefetch = 0 : i64, scratch_operands = 0 : i64, tpu.core_type = #tpu.core_type<tc>} {
    %c0 = arith.constant 0 : index
    %c0_0 = arith.constant 0 : index
    %c0_1 = arith.constant 0 : index
    %0 = vector.load %arg1[%c0, %c0_0, %c0_1] : memref<2x1x8xf32, #tpu.memory_space<vmem>>, vector<2x1x8xf32>
    %c0_2 = arith.constant 0 : index
    %c0_3 = arith.constant 0 : index
    %1 = vector.load %arg2[%c0_2, %c0_3] : memref<16x1xf32, #tpu.memory_space<vmem>>, vector<16x1xf32>
    %cst = arith.constant 1.000000e+00 : f32
    %2 = vector.broadcast %cst : f32 to vector<2x1x8xf32>
    %3 = arith.subf %2, %0 : vector<2x1x8xf32>
    %cst_4 = arith.constant -1.000000e+09 : f32
    %4 = vector.broadcast %cst_4 : f32 to vector<2x1x8xf32>
    %5 = arith.mulf %3, %4 : vector<2x1x8xf32>
    %6 = tpu.iota {dimensions = array<i32: 1>} : vector<16x50xi32>
    %c0_5 = arith.constant 0 : index
    %c0_6 = arith.constant 0 : index
    %7 = vector.load %arg0[%c0_5, %c0_6] : memref<16x1xi32, #tpu.memory_space<vmem>>, vector<16x1xi32>
    %8 = vector.broadcast %7 : vector<16x1xi32> to vector<16x50xi32>
    %9 = arith.cmpi eq, %8, %6 : vector<16x50xi32>
    %10 = arith.extui %9 : vector<16x50xi1> to vector<16x50xi32>
    %11 = arith.sitofp %10 : vector<16x50xi32> to vector<16x50xf32>
    %c0_7 = arith.constant 0 : index
    %c0_8 = arith.constant 0 : index
    %12 = vector.load %arg4[%c0_7, %c0_8] : memref<50x32xf32, #tpu.memory_space<vmem>>, vector<50x32xf32>
    %cst_9 = arith.constant dense<0.000000e+00> : vector<16x32xf32>
    %13 = tpu.matmul %11, %12, %cst_9 {dimension_numbers = #tpu.dot_dimension_numbers<[1], [0], [0], [1], [0, 0, 1, 1], [], []>} : vector<16x50xf32>, vector<50x32xf32>, vector<16x32xf32> -> vector<16x32xf32>
    %c0_10 = arith.constant 0 : index
    %c0_11 = arith.constant 0 : index
    %14 = vector.load %arg5[%c0_10, %c0_11] : memref<16x32xf32, #tpu.memory_space<vmem>>, vector<16x32xf32>
    %15 = arith.addf %13, %14 : vector<16x32xf32>
    %c0_12 = arith.constant 0 : index
    %c0_13 = arith.constant 0 : index
    %16 = vector.load %arg6[%c0_12, %c0_13] : memref<2x32xf32, #tpu.memory_space<vmem>>, vector<2x32xf32>
    %17 = vector.extract_strided_slice %16 {offsets = [0, 0], sizes = [1, 32], strides = [1, 1]} : vector<2x32xf32> to vector<1x32xf32>
    %18 = vector.extract_strided_slice %16 {offsets = [1, 0], sizes = [1, 32], strides = [1, 1]} : vector<2x32xf32> to vector<1x32xf32>
    %cst_14 = arith.constant dense<0.000000e+00> : vector<16xf32>
    %19 = vector.multi_reduction <add>, %15, %cst_14 [1] : vector<16x32xf32> to vector<16xf32>
    %20 = vector.shape_cast %19 : vector<16xf32> to vector<16x1xf32>
    %cst_15 = arith.constant 3.200000e+01 : f32
    %21 = vector.broadcast %cst_15 : f32 to vector<16x1xf32>
    %22 = arith.divf %20, %21 : vector<16x1xf32>
    %23 = vector.broadcast %22 : vector<16x1xf32> to vector<16x32xf32>
    %24 = arith.subf %15, %23 : vector<16x32xf32>
    %25 = arith.mulf %24, %24 : vector<16x32xf32>
    %cst_16 = arith.constant dense<0.000000e+00> : vector<16xf32>
    %26 = vector.multi_reduction <add>, %25, %cst_16 [1] : vector<16x32xf32> to vector<16xf32>
    %27 = vector.shape_cast %26 : vector<16xf32> to vector<16x1xf32>
    %cst_17 = arith.constant 3.200000e+01 : f32
    %28 = vector.broadcast %cst_17 : f32 to vector<16x1xf32>
    %29 = arith.divf %27, %28 : vector<16x1xf32>
    %30 = vector.broadcast %22 : vector<16x1xf32> to vector<16x32xf32>
    %31 = arith.subf %15, %30 : vector<16x32xf32>
    %cst_18 = arith.constant 9.99999996E-13 : f32
    %32 = vector.broadcast %cst_18 : f32 to vector<16x1xf32>
    %33 = arith.addf %29, %32 : vector<16x1xf32>
    %34 = math.rsqrt %33 : vector<16x1xf32>
    %35 = vector.broadcast %34 : vector<16x1xf32> to vector<16x32xf32>
    %36 = arith.mulf %31, %35 : vector<16x32xf32>
    %37 = vector.broadcast %17 : vector<1x32xf32> to vector<16x32xf32>
    %38 = arith.mulf %36, %37 : vector<16x32xf32>
    %39 = vector.broadcast %18 : vector<1x32xf32> to vector<16x32xf32>
    %40 = arith.addf %38, %39 : vector<16x32xf32>
    %41 = vector.broadcast %1 : vector<16x1xf32> to vector<16x32xf32>
    %42 = arith.mulf %40, %41 : vector<16x32xf32>
    %c0_19 = arith.constant 0 : index
    %c0_20 = arith.constant 0 : index
    %c0_21 = arith.constant 0 : index
    %43 = vector.load %arg7[%c0_19, %c0_20, %c0_21] : memref<2x32x96xf32, #tpu.memory_space<vmem>>, vector<1x32x96xf32>
    %44 = vector.shape_cast %43 : vector<1x32x96xf32> to vector<32x96xf32>
    %cst_22 = arith.constant dense<0.000000e+00> : vector<16x96xf32>
    %45 = tpu.matmul %42, %44, %cst_22 {dimension_numbers = #tpu.dot_dimension_numbers<[1], [0], [0], [1], [0, 0, 1, 1], [], []>} : vector<16x32xf32>, vector<32x96xf32>, vector<16x96xf32> -> vector<16x96xf32>
    %c0_23 = arith.constant 0 : index
    %c0_24 = arith.constant 0 : index
    %c0_25 = arith.constant 0 : index
    %46 = vector.load %arg8[%c0_23, %c0_24, %c0_25] : memref<2x1x96xf32, #tpu.memory_space<vmem>>, vector<1x1x96xf32>
    %47 = vector.shape_cast %46 : vector<1x1x96xf32> to vector<1x96xf32>
    %48 = vector.broadcast %47 : vector<1x96xf32> to vector<16x96xf32>
    %49 = arith.addf %45, %48 : vector<16x96xf32>
    %c0_26 = arith.constant 0 : index
    %c0_27 = arith.constant 0 : index
    %c0_28 = arith.constant 0 : index
    %50 = vector.load %arg9[%c0_26, %c0_27, %c0_28] : memref<2x32x32xf32, #tpu.memory_space<vmem>>, vector<1x32x32xf32>
    %51 = vector.shape_cast %50 : vector<1x32x32xf32> to vector<32x32xf32>
    %cst_29 = arith.constant 0.000000e+00 : f32
    %52 = vector.broadcast %cst_29 : f32 to vector<16x32xf32>
    %53 = vector.extract_strided_slice %49 {offsets = [0, 0], sizes = [16, 8], strides = [1, 1]} : vector<16x96xf32> to vector<16x8xf32>
    %54 = vector.shape_cast %53 : vector<16x8xf32> to vector<2x8x8xf32>
    %55 = vector.extract_strided_slice %49 {offsets = [0, 32], sizes = [16, 8], strides = [1, 1]} : vector<16x96xf32> to vector<16x8xf32>
    %56 = vector.shape_cast %55 : vector<16x8xf32> to vector<2x8x8xf32>
    %57 = vector.extract_strided_slice %49 {offsets = [0, 64], sizes = [16, 8], strides = [1, 1]} : vector<16x96xf32> to vector<16x8xf32>
    %58 = vector.shape_cast %57 : vector<16x8xf32> to vector<2x8x8xf32>
    "tpu.trace_start"() <{level = 10 : i32, message = "bqd,bkd->bqk"}> : () -> ()
    %cst_30 = arith.constant dense<0.000000e+00> : vector<2x8x8xf32>
    %59 = tpu.matmul %54, %56, %cst_30 {dimension_numbers = #tpu.dot_dimension_numbers<[2], [2], [1], [1], [0, 0, 0, 1, 1, 1], [0], [0]>} : vector<2x8x8xf32>, vector<2x8x8xf32>, vector<2x8x8xf32> -> vector<2x8x8xf32>
    "tpu.trace_stop"() : () -> ()
    %cst_31 = arith.constant 0.353553385 : f32
    %60 = vector.broadcast %cst_31 : f32 to vector<2x8x8xf32>
    %61 = arith.mulf %59, %60 : vector<2x8x8xf32>
    %62 = vector.broadcast %5 : vector<2x1x8xf32> to vector<2x8x8xf32>
    %63 = arith.addf %61, %62 : vector<2x8x8xf32>
    %cst_32 = arith.constant dense<0xFF800000> : vector<2x8xf32>
    %64 = vector.multi_reduction <maximumf>, %63, %cst_32 [2] : vector<2x8x8xf32> to vector<2x8xf32>
    %65 = vector.shape_cast %64 : vector<2x8xf32> to vector<2x8x1xf32>
    %66 = vector.broadcast %65 : vector<2x8x1xf32> to vector<2x8x8xf32>
    %67 = arith.subf %63, %66 : vector<2x8x8xf32>
    %68 = math.exp %67 : vector<2x8x8xf32>
    %cst_33 = arith.constant dense<0.000000e+00> : vector<2x8xf32>
    %69 = vector.multi_reduction <add>, %68, %cst_33 [2] : vector<2x8x8xf32> to vector<2x8xf32>
    %70 = vector.shape_cast %69 : vector<2x8xf32> to vector<2x8x1xf32>
    %71 = tpu.reciprocal %70 {approx = true} : vector<2x8x1xf32> -> vector<2x8x1xf32>
    %72 = vector.broadcast %71 : vector<2x8x1xf32> to vector<2x8x8xf32>
    %73 = arith.mulf %68, %72 : vector<2x8x8xf32>
    "tpu.trace_start"() <{level = 10 : i32, message = "bqk,bkd->bqd"}> : () -> ()
    %cst_34 = arith.constant dense<0.000000e+00> : vector<2x8x8xf32>
    %74 = tpu.matmul %73, %58, %cst_34 {dimension_numbers = #tpu.dot_dimension_numbers<[2], [1], [1], [2], [0, 0, 0, 1, 1, 2], [0], [0]>} : vector<2x8x8xf32>, vector<2x8x8xf32>, vector<2x8x8xf32> -> vector<2x8x8xf32>
    "tpu.trace_stop"() : () -> ()
    %75 = vector.shape_cast %74 : vector<2x8x8xf32> to vector<16x8xf32>
    %76 = vector.extract_strided_slice %51 {offsets = [0, 0], sizes = [8, 32], strides = [1, 1]} : vector<32x32xf32> to vector<8x32xf32>
    %cst_35 = arith.constant dense<0.000000e+00> : vector<16x32xf32>
    %77 = tpu.matmul %75, %76, %cst_35 {dimension_numbers = #tpu.dot_dimension_numbers<[1], [0], [0], [1], [0, 0, 1, 1], [], []>} : vector<16x8xf32>, vector<8x32xf32>, vector<16x32xf32> -> vector<16x32xf32>
    %78 = arith.addf %52, %77 : vector<16x32xf32>
    %79 = vector.extract_strided_slice %49 {offsets = [0, 8], sizes = [16, 8], strides = [1, 1]} : vector<16x96xf32> to vector<16x8xf32>
    %80 = vector.shape_cast %79 : vector<16x8xf32> to vector<2x8x8xf32>
    %81 = vector.extract_strided_slice %49 {offsets = [0, 40], sizes = [16, 8], strides = [1, 1]} : vector<16x96xf32> to vector<16x8xf32>
    %82 = vector.shape_cast %81 : vector<16x8xf32> to vector<2x8x8xf32>
    %83 = vector.extract_strided_slice %49 {offsets = [0, 72], sizes = [16, 8], strides = [1, 1]} : vector<16x96xf32> to vector<16x8xf32>
    %84 = vector.shape_cast %83 : vector<16x8xf32> to vector<2x8x8xf32>
    "tpu.trace_start"() <{level = 10 : i32, message = "bqd,bkd->bqk"}> : () -> ()
    %cst_36 = arith.constant dense<0.000000e+00> : vector<2x8x8xf32>
    %85 = tpu.matmul %80, %82, %cst_36 {dimension_numbers = #tpu.dot_dimension_numbers<[2], [2], [1], [1], [0, 0, 0, 1, 1, 1], [0], [0]>} : vector<2x8x8xf32>, vector<2x8x8xf32>, vector<2x8x8xf32> -> vector<2x8x8xf32>
    "tpu.trace_stop"() : () -> ()
    %cst_37 = arith.constant 0.353553385 : f32
    %86 = vector.broadcast %cst_37 : f32 to vector<2x8x8xf32>
    %87 = arith.mulf %85, %86 : vector<2x8x8xf32>
    %88 = vector.broadcast %5 : vector<2x1x8xf32> to vector<2x8x8xf32>
    %89 = arith.addf %87, %88 : vector<2x8x8xf32>
    %cst_38 = arith.constant dense<0xFF800000> : vector<2x8xf32>
    %90 = vector.multi_reduction <maximumf>, %89, %cst_38 [2] : vector<2x8x8xf32> to vector<2x8xf32>
    %91 = vector.shape_cast %90 : vector<2x8xf32> to vector<2x8x1xf32>
    %92 = vector.broadcast %91 : vector<2x8x1xf32> to vector<2x8x8xf32>
    %93 = arith.subf %89, %92 : vector<2x8x8xf32>
    %94 = math.exp %93 : vector<2x8x8xf32>
    %cst_39 = arith.constant dense<0.000000e+00> : vector<2x8xf32>
    %95 = vector.multi_reduction <add>, %94, %cst_39 [2] : vector<2x8x8xf32> to vector<2x8xf32>
    %96 = vector.shape_cast %95 : vector<2x8xf32> to vector<2x8x1xf32>
    %97 = tpu.reciprocal %96 {approx = true} : vector<2x8x1xf32> -> vector<2x8x1xf32>
    %98 = vector.broadcast %97 : vector<2x8x1xf32> to vector<2x8x8xf32>
    %99 = arith.mulf %94, %98 : vector<2x8x8xf32>
    "tpu.trace_start"() <{level = 10 : i32, message = "bqk,bkd->bqd"}> : () -> ()
    %cst_40 = arith.constant dense<0.000000e+00> : vector<2x8x8xf32>
    %100 = tpu.matmul %99, %84, %cst_40 {dimension_numbers = #tpu.dot_dimension_numbers<[2], [1], [1], [2], [0, 0, 0, 1, 1, 2], [0], [0]>} : vector<2x8x8xf32>, vector<2x8x8xf32>, vector<2x8x8xf32> -> vector<2x8x8xf32>
    "tpu.trace_stop"() : () -> ()
    %101 = vector.shape_cast %100 : vector<2x8x8xf32> to vector<16x8xf32>
    %102 = vector.extract_strided_slice %51 {offsets = [8, 0], sizes = [8, 32], strides = [1, 1]} : vector<32x32xf32> to vector<8x32xf32>
    %cst_41 = arith.constant dense<0.000000e+00> : vector<16x32xf32>
    %103 = tpu.matmul %101, %102, %cst_41 {dimension_numbers = #tpu.dot_dimension_numbers<[1], [0], [0], [1], [0, 0, 1, 1], [], []>} : vector<16x8xf32>, vector<8x32xf32>, vector<16x32xf32> -> vector<16x32xf32>
    %104 = arith.addf %78, %103 : vector<16x32xf32>
    %105 = vector.extract_strided_slice %49 {offsets = [0, 16], sizes = [16, 8], strides = [1, 1]} : vector<16x96xf32> to vector<16x8xf32>
    %106 = vector.shape_cast %105 : vector<16x8xf32> to vector<2x8x8xf32>
    %107 = vector.extract_strided_slice %49 {offsets = [0, 48], sizes = [16, 8], strides = [1, 1]} : vector<16x96xf32> to vector<16x8xf32>
    %108 = vector.shape_cast %107 : vector<16x8xf32> to vector<2x8x8xf32>
    %109 = vector.extract_strided_slice %49 {offsets = [0, 80], sizes = [16, 8], strides = [1, 1]} : vector<16x96xf32> to vector<16x8xf32>
    %110 = vector.shape_cast %109 : vector<16x8xf32> to vector<2x8x8xf32>
    "tpu.trace_start"() <{level = 10 : i32, message = "bqd,bkd->bqk"}> : () -> ()
    %cst_42 = arith.constant dense<0.000000e+00> : vector<2x8x8xf32>
    %111 = tpu.matmul %106, %108, %cst_42 {dimension_numbers = #tpu.dot_dimension_numbers<[2], [2], [1], [1], [0, 0, 0, 1, 1, 1], [0], [0]>} : vector<2x8x8xf32>, vector<2x8x8xf32>, vector<2x8x8xf32> -> vector<2x8x8xf32>
    "tpu.trace_stop"() : () -> ()
    %cst_43 = arith.constant 0.353553385 : f32
    %112 = vector.broadcast %cst_43 : f32 to vector<2x8x8xf32>
    %113 = arith.mulf %111, %112 : vector<2x8x8xf32>
    %114 = vector.broadcast %5 : vector<2x1x8xf32> to vector<2x8x8xf32>
    %115 = arith.addf %113, %114 : vector<2x8x8xf32>
    %cst_44 = arith.constant dense<0xFF800000> : vector<2x8xf32>
    %116 = vector.multi_reduction <maximumf>, %115, %cst_44 [2] : vector<2x8x8xf32> to vector<2x8xf32>
    %117 = vector.shape_cast %116 : vector<2x8xf32> to vector<2x8x1xf32>
    %118 = vector.broadcast %117 : vector<2x8x1xf32> to vector<2x8x8xf32>
    %119 = arith.subf %115, %118 : vector<2x8x8xf32>
    %120 = math.exp %119 : vector<2x8x8xf32>
    %cst_45 = arith.constant dense<0.000000e+00> : vector<2x8xf32>
    %121 = vector.multi_reduction <add>, %120, %cst_45 [2] : vector<2x8x8xf32> to vector<2x8xf32>
    %122 = vector.shape_cast %121 : vector<2x8xf32> to vector<2x8x1xf32>
    %123 = tpu.reciprocal %122 {approx = true} : vector<2x8x1xf32> -> vector<2x8x1xf32>
    %124 = vector.broadcast %123 : vector<2x8x1xf32> to vector<2x8x8xf32>
    %125 = arith.mulf %120, %124 : vector<2x8x8xf32>
    "tpu.trace_start"() <{level = 10 : i32, message = "bqk,bkd->bqd"}> : () -> ()
    %cst_46 = arith.constant dense<0.000000e+00> : vector<2x8x8xf32>
    %126 = tpu.matmul %125, %110, %cst_46 {dimension_numbers = #tpu.dot_dimension_numbers<[2], [1], [1], [2], [0, 0, 0, 1, 1, 2], [0], [0]>} : vector<2x8x8xf32>, vector<2x8x8xf32>, vector<2x8x8xf32> -> vector<2x8x8xf32>
    "tpu.trace_stop"() : () -> ()
    %127 = vector.shape_cast %126 : vector<2x8x8xf32> to vector<16x8xf32>
    %128 = vector.extract_strided_slice %51 {offsets = [16, 0], sizes = [8, 32], strides = [1, 1]} : vector<32x32xf32> to vector<8x32xf32>
    %cst_47 = arith.constant dense<0.000000e+00> : vector<16x32xf32>
    %129 = tpu.matmul %127, %128, %cst_47 {dimension_numbers = #tpu.dot_dimension_numbers<[1], [0], [0], [1], [0, 0, 1, 1], [], []>} : vector<16x8xf32>, vector<8x32xf32>, vector<16x32xf32> -> vector<16x32xf32>
    %130 = arith.addf %104, %129 : vector<16x32xf32>
    %131 = vector.extract_strided_slice %49 {offsets = [0, 24], sizes = [16, 8], strides = [1, 1]} : vector<16x96xf32> to vector<16x8xf32>
    %132 = vector.shape_cast %131 : vector<16x8xf32> to vector<2x8x8xf32>
    %133 = vector.extract_strided_slice %49 {offsets = [0, 56], sizes = [16, 8], strides = [1, 1]} : vector<16x96xf32> to vector<16x8xf32>
    %134 = vector.shape_cast %133 : vector<16x8xf32> to vector<2x8x8xf32>
    %135 = vector.extract_strided_slice %49 {offsets = [0, 88], sizes = [16, 8], strides = [1, 1]} : vector<16x96xf32> to vector<16x8xf32>
    %136 = vector.shape_cast %135 : vector<16x8xf32> to vector<2x8x8xf32>
    "tpu.trace_start"() <{level = 10 : i32, message = "bqd,bkd->bqk"}> : () -> ()
    %cst_48 = arith.constant dense<0.000000e+00> : vector<2x8x8xf32>
    %137 = tpu.matmul %132, %134, %cst_48 {dimension_numbers = #tpu.dot_dimension_numbers<[2], [2], [1], [1], [0, 0, 0, 1, 1, 1], [0], [0]>} : vector<2x8x8xf32>, vector<2x8x8xf32>, vector<2x8x8xf32> -> vector<2x8x8xf32>
    "tpu.trace_stop"() : () -> ()
    %cst_49 = arith.constant 0.353553385 : f32
    %138 = vector.broadcast %cst_49 : f32 to vector<2x8x8xf32>
    %139 = arith.mulf %137, %138 : vector<2x8x8xf32>
    %140 = vector.broadcast %5 : vector<2x1x8xf32> to vector<2x8x8xf32>
    %141 = arith.addf %139, %140 : vector<2x8x8xf32>
    %cst_50 = arith.constant dense<0xFF800000> : vector<2x8xf32>
    %142 = vector.multi_reduction <maximumf>, %141, %cst_50 [2] : vector<2x8x8xf32> to vector<2x8xf32>
    %143 = vector.shape_cast %142 : vector<2x8xf32> to vector<2x8x1xf32>
    %144 = vector.broadcast %143 : vector<2x8x1xf32> to vector<2x8x8xf32>
    %145 = arith.subf %141, %144 : vector<2x8x8xf32>
    %146 = math.exp %145 : vector<2x8x8xf32>
    %cst_51 = arith.constant dense<0.000000e+00> : vector<2x8xf32>
    %147 = vector.multi_reduction <add>, %146, %cst_51 [2] : vector<2x8x8xf32> to vector<2x8xf32>
    %148 = vector.shape_cast %147 : vector<2x8xf32> to vector<2x8x1xf32>
    %149 = tpu.reciprocal %148 {approx = true} : vector<2x8x1xf32> -> vector<2x8x1xf32>
    %150 = vector.broadcast %149 : vector<2x8x1xf32> to vector<2x8x8xf32>
    %151 = arith.mulf %146, %150 : vector<2x8x8xf32>
    "tpu.trace_start"() <{level = 10 : i32, message = "bqk,bkd->bqd"}> : () -> ()
    %cst_52 = arith.constant dense<0.000000e+00> : vector<2x8x8xf32>
    %152 = tpu.matmul %151, %136, %cst_52 {dimension_numbers = #tpu.dot_dimension_numbers<[2], [1], [1], [2], [0, 0, 0, 1, 1, 2], [0], [0]>} : vector<2x8x8xf32>, vector<2x8x8xf32>, vector<2x8x8xf32> -> vector<2x8x8xf32>
    "tpu.trace_stop"() : () -> ()
    %153 = vector.shape_cast %152 : vector<2x8x8xf32> to vector<16x8xf32>
    %154 = vector.extract_strided_slice %51 {offsets = [24, 0], sizes = [8, 32], strides = [1, 1]} : vector<32x32xf32> to vector<8x32xf32>
    %cst_53 = arith.constant dense<0.000000e+00> : vector<16x32xf32>
    %155 = tpu.matmul %153, %154, %cst_53 {dimension_numbers = #tpu.dot_dimension_numbers<[1], [0], [0], [1], [0, 0, 1, 1], [], []>} : vector<16x8xf32>, vector<8x32xf32>, vector<16x32xf32> -> vector<16x32xf32>
    %156 = arith.addf %130, %155 : vector<16x32xf32>
    %c0_54 = arith.constant 0 : index
    %c0_55 = arith.constant 0 : index
    %c0_56 = arith.constant 0 : index
    %157 = vector.load %arg10[%c0_54, %c0_55, %c0_56] : memref<2x1x32xf32, #tpu.memory_space<vmem>>, vector<1x1x32xf32>
    %158 = vector.shape_cast %157 : vector<1x1x32xf32> to vector<1x32xf32>
    %159 = vector.broadcast %158 : vector<1x32xf32> to vector<16x32xf32>
    %160 = arith.addf %156, %159 : vector<16x32xf32>
    %161 = arith.addf %42, %160 : vector<16x32xf32>
    %c0_57 = arith.constant 0 : index
    %c0_58 = arith.constant 0 : index
    %c0_59 = arith.constant 0 : index
    %162 = vector.load %arg11[%c0_57, %c0_58, %c0_59] : memref<2x2x32xf32, #tpu.memory_space<vmem>>, vector<1x2x32xf32>
    %163 = vector.shape_cast %162 : vector<1x2x32xf32> to vector<2x32xf32>
    %164 = vector.extract_strided_slice %163 {offsets = [0, 0], sizes = [1, 32], strides = [1, 1]} : vector<2x32xf32> to vector<1x32xf32>
    %165 = vector.extract_strided_slice %163 {offsets = [1, 0], sizes = [1, 32], strides = [1, 1]} : vector<2x32xf32> to vector<1x32xf32>
    %cst_60 = arith.constant dense<0.000000e+00> : vector<16xf32>
    %166 = vector.multi_reduction <add>, %161, %cst_60 [1] : vector<16x32xf32> to vector<16xf32>
    %167 = vector.shape_cast %166 : vector<16xf32> to vector<16x1xf32>
    %cst_61 = arith.constant 3.200000e+01 : f32
    %168 = vector.broadcast %cst_61 : f32 to vector<16x1xf32>
    %169 = arith.divf %167, %168 : vector<16x1xf32>
    %170 = vector.broadcast %169 : vector<16x1xf32> to vector<16x32xf32>
    %171 = arith.subf %161, %170 : vector<16x32xf32>
    %172 = arith.mulf %171, %171 : vector<16x32xf32>
    %cst_62 = arith.constant dense<0.000000e+00> : vector<16xf32>
    %173 = vector.multi_reduction <add>, %172, %cst_62 [1] : vector<16x32xf32> to vector<16xf32>
    %174 = vector.shape_cast %173 : vector<16xf32> to vector<16x1xf32>
    %cst_63 = arith.constant 3.200000e+01 : f32
    %175 = vector.broadcast %cst_63 : f32 to vector<16x1xf32>
    %176 = arith.divf %174, %175 : vector<16x1xf32>
    %177 = vector.broadcast %169 : vector<16x1xf32> to vector<16x32xf32>
    %178 = arith.subf %161, %177 : vector<16x32xf32>
    %cst_64 = arith.constant 9.99999996E-13 : f32
    %179 = vector.broadcast %cst_64 : f32 to vector<16x1xf32>
    %180 = arith.addf %176, %179 : vector<16x1xf32>
    %181 = math.rsqrt %180 : vector<16x1xf32>
    %182 = vector.broadcast %181 : vector<16x1xf32> to vector<16x32xf32>
    %183 = arith.mulf %178, %182 : vector<16x32xf32>
    %184 = vector.broadcast %164 : vector<1x32xf32> to vector<16x32xf32>
    %185 = arith.mulf %183, %184 : vector<16x32xf32>
    %186 = vector.broadcast %165 : vector<1x32xf32> to vector<16x32xf32>
    %187 = arith.addf %185, %186 : vector<16x32xf32>
    %c0_65 = arith.constant 0 : index
    %c0_66 = arith.constant 0 : index
    %c0_67 = arith.constant 0 : index
    %188 = vector.load %arg12[%c0_65, %c0_66, %c0_67] : memref<2x32x128xf32, #tpu.memory_space<vmem>>, vector<1x32x128xf32>
    %189 = vector.shape_cast %188 : vector<1x32x128xf32> to vector<32x128xf32>
    %cst_68 = arith.constant dense<0.000000e+00> : vector<16x128xf32>
    %190 = tpu.matmul %187, %189, %cst_68 {dimension_numbers = #tpu.dot_dimension_numbers<[1], [0], [0], [1], [0, 0, 1, 1], [], []>} : vector<16x32xf32>, vector<32x128xf32>, vector<16x128xf32> -> vector<16x128xf32>
    %c0_69 = arith.constant 0 : index
    %c0_70 = arith.constant 0 : index
    %c0_71 = arith.constant 0 : index
    %191 = vector.load %arg13[%c0_69, %c0_70, %c0_71] : memref<2x1x128xf32, #tpu.memory_space<vmem>>, vector<1x1x128xf32>
    %192 = vector.shape_cast %191 : vector<1x1x128xf32> to vector<1x128xf32>
    %193 = vector.broadcast %192 : vector<1x128xf32> to vector<16x128xf32>
    %194 = arith.addf %190, %193 : vector<16x128xf32>
    %195 = arith.mulf %194, %194 : vector<16x128xf32>
    %196 = arith.mulf %194, %195 : vector<16x128xf32>
    %cst_72 = arith.constant 4.471500e-02 : f32
    %197 = vector.broadcast %cst_72 : f32 to vector<16x128xf32>
    %198 = arith.mulf %197, %196 : vector<16x128xf32>
    %199 = arith.addf %194, %198 : vector<16x128xf32>
    %cst_73 = arith.constant 0.797884583 : f32
    %200 = vector.broadcast %cst_73 : f32 to vector<16x128xf32>
    %201 = arith.mulf %200, %199 : vector<16x128xf32>
    %202 = math.tanh %201 : vector<16x128xf32>
    %cst_74 = arith.constant 1.000000e+00 : f32
    %203 = vector.broadcast %cst_74 : f32 to vector<16x128xf32>
    %204 = arith.addf %203, %202 : vector<16x128xf32>
    %cst_75 = arith.constant 5.000000e-01 : f32
    %205 = vector.broadcast %cst_75 : f32 to vector<16x128xf32>
    %206 = arith.mulf %205, %204 : vector<16x128xf32>
    %207 = arith.mulf %194, %206 : vector<16x128xf32>
    %c0_76 = arith.constant 0 : index
    %c0_77 = arith.constant 0 : index
    %c0_78 = arith.constant 0 : index
    %208 = vector.load %arg14[%c0_76, %c0_77, %c0_78] : memref<2x128x32xf32, #tpu.memory_space<vmem>>, vector<1x128x32xf32>
    %209 = vector.shape_cast %208 : vector<1x128x32xf32> to vector<128x32xf32>
    %cst_79 = arith.constant dense<0.000000e+00> : vector<16x32xf32>
    %210 = tpu.matmul %207, %209, %cst_79 {dimension_numbers = #tpu.dot_dimension_numbers<[1], [0], [0], [1], [0, 0, 1, 1], [], []>} : vector<16x128xf32>, vector<128x32xf32>, vector<16x32xf32> -> vector<16x32xf32>
    %c0_80 = arith.constant 0 : index
    %c0_81 = arith.constant 0 : index
    %c0_82 = arith.constant 0 : index
    %211 = vector.load %arg15[%c0_80, %c0_81, %c0_82] : memref<2x1x32xf32, #tpu.memory_space<vmem>>, vector<1x1x32xf32>
    %212 = vector.shape_cast %211 : vector<1x1x32xf32> to vector<1x32xf32>
    %213 = vector.broadcast %212 : vector<1x32xf32> to vector<16x32xf32>
    %214 = arith.addf %210, %213 : vector<16x32xf32>
    %215 = arith.addf %187, %214 : vector<16x32xf32>
    %c0_83 = arith.constant 0 : index
    %c0_84 = arith.constant 0 : index
    %c0_85 = arith.constant 0 : index
    %216 = vector.load %arg16[%c0_83, %c0_84, %c0_85] : memref<2x2x32xf32, #tpu.memory_space<vmem>>, vector<1x2x32xf32>
    %217 = vector.shape_cast %216 : vector<1x2x32xf32> to vector<2x32xf32>
    %218 = vector.extract_strided_slice %217 {offsets = [0, 0], sizes = [1, 32], strides = [1, 1]} : vector<2x32xf32> to vector<1x32xf32>
    %219 = vector.extract_strided_slice %217 {offsets = [1, 0], sizes = [1, 32], strides = [1, 1]} : vector<2x32xf32> to vector<1x32xf32>
    %cst_86 = arith.constant dense<0.000000e+00> : vector<16xf32>
    %220 = vector.multi_reduction <add>, %215, %cst_86 [1] : vector<16x32xf32> to vector<16xf32>
    %221 = vector.shape_cast %220 : vector<16xf32> to vector<16x1xf32>
    %cst_87 = arith.constant 3.200000e+01 : f32
    %222 = vector.broadcast %cst_87 : f32 to vector<16x1xf32>
    %223 = arith.divf %221, %222 : vector<16x1xf32>
    %224 = vector.broadcast %223 : vector<16x1xf32> to vector<16x32xf32>
    %225 = arith.subf %215, %224 : vector<16x32xf32>
    %226 = arith.mulf %225, %225 : vector<16x32xf32>
    %cst_88 = arith.constant dense<0.000000e+00> : vector<16xf32>
    %227 = vector.multi_reduction <add>, %226, %cst_88 [1] : vector<16x32xf32> to vector<16xf32>
    %228 = vector.shape_cast %227 : vector<16xf32> to vector<16x1xf32>
    %cst_89 = arith.constant 3.200000e+01 : f32
    %229 = vector.broadcast %cst_89 : f32 to vector<16x1xf32>
    %230 = arith.divf %228, %229 : vector<16x1xf32>
    %231 = vector.broadcast %223 : vector<16x1xf32> to vector<16x32xf32>
    %232 = arith.subf %215, %231 : vector<16x32xf32>
    %cst_90 = arith.constant 9.99999996E-13 : f32
    %233 = vector.broadcast %cst_90 : f32 to vector<16x1xf32>
    %234 = arith.addf %230, %233 : vector<16x1xf32>
    %235 = math.rsqrt %234 : vector<16x1xf32>
    %236 = vector.broadcast %235 : vector<16x1xf32> to vector<16x32xf32>
    %237 = arith.mulf %232, %236 : vector<16x32xf32>
    %238 = vector.broadcast %218 : vector<1x32xf32> to vector<16x32xf32>
    %239 = arith.mulf %237, %238 : vector<16x32xf32>
    %240 = vector.broadcast %219 : vector<1x32xf32> to vector<16x32xf32>
    %241 = arith.addf %239, %240 : vector<16x32xf32>
    %242 = vector.broadcast %1 : vector<16x1xf32> to vector<16x32xf32>
    %243 = arith.mulf %241, %242 : vector<16x32xf32>
    %c1 = arith.constant 1 : index
    %c0_91 = arith.constant 0 : index
    %c0_92 = arith.constant 0 : index
    %244 = vector.load %arg7[%c1, %c0_91, %c0_92] : memref<2x32x96xf32, #tpu.memory_space<vmem>>, vector<1x32x96xf32>
    %245 = vector.shape_cast %244 : vector<1x32x96xf32> to vector<32x96xf32>
    %cst_93 = arith.constant dense<0.000000e+00> : vector<16x96xf32>
    %246 = tpu.matmul %243, %245, %cst_93 {dimension_numbers = #tpu.dot_dimension_numbers<[1], [0], [0], [1], [0, 0, 1, 1], [], []>} : vector<16x32xf32>, vector<32x96xf32>, vector<16x96xf32> -> vector<16x96xf32>
    %c1_94 = arith.constant 1 : index
    %c0_95 = arith.constant 0 : index
    %c0_96 = arith.constant 0 : index
    %247 = vector.load %arg8[%c1_94, %c0_95, %c0_96] : memref<2x1x96xf32, #tpu.memory_space<vmem>>, vector<1x1x96xf32>
    %248 = vector.shape_cast %247 : vector<1x1x96xf32> to vector<1x96xf32>
    %249 = vector.broadcast %248 : vector<1x96xf32> to vector<16x96xf32>
    %250 = arith.addf %246, %249 : vector<16x96xf32>
    %c1_97 = arith.constant 1 : index
    %c0_98 = arith.constant 0 : index
    %c0_99 = arith.constant 0 : index
    %251 = vector.load %arg9[%c1_97, %c0_98, %c0_99] : memref<2x32x32xf32, #tpu.memory_space<vmem>>, vector<1x32x32xf32>
    %252 = vector.shape_cast %251 : vector<1x32x32xf32> to vector<32x32xf32>
    %cst_100 = arith.constant 0.000000e+00 : f32
    %253 = vector.broadcast %cst_100 : f32 to vector<16x32xf32>
    %254 = vector.extract_strided_slice %250 {offsets = [0, 0], sizes = [16, 8], strides = [1, 1]} : vector<16x96xf32> to vector<16x8xf32>
    %255 = vector.shape_cast %254 : vector<16x8xf32> to vector<2x8x8xf32>
    %256 = vector.extract_strided_slice %250 {offsets = [0, 32], sizes = [16, 8], strides = [1, 1]} : vector<16x96xf32> to vector<16x8xf32>
    %257 = vector.shape_cast %256 : vector<16x8xf32> to vector<2x8x8xf32>
    %258 = vector.extract_strided_slice %250 {offsets = [0, 64], sizes = [16, 8], strides = [1, 1]} : vector<16x96xf32> to vector<16x8xf32>
    %259 = vector.shape_cast %258 : vector<16x8xf32> to vector<2x8x8xf32>
    "tpu.trace_start"() <{level = 10 : i32, message = "bqd,bkd->bqk"}> : () -> ()
    %cst_101 = arith.constant dense<0.000000e+00> : vector<2x8x8xf32>
    %260 = tpu.matmul %255, %257, %cst_101 {dimension_numbers = #tpu.dot_dimension_numbers<[2], [2], [1], [1], [0, 0, 0, 1, 1, 1], [0], [0]>} : vector<2x8x8xf32>, vector<2x8x8xf32>, vector<2x8x8xf32> -> vector<2x8x8xf32>
    "tpu.trace_stop"() : () -> ()
    %cst_102 = arith.constant 0.353553385 : f32
    %261 = vector.broadcast %cst_102 : f32 to vector<2x8x8xf32>
    %262 = arith.mulf %260, %261 : vector<2x8x8xf32>
    %263 = vector.broadcast %5 : vector<2x1x8xf32> to vector<2x8x8xf32>
    %264 = arith.addf %262, %263 : vector<2x8x8xf32>
    %cst_103 = arith.constant dense<0xFF800000> : vector<2x8xf32>
    %265 = vector.multi_reduction <maximumf>, %264, %cst_103 [2] : vector<2x8x8xf32> to vector<2x8xf32>
    %266 = vector.shape_cast %265 : vector<2x8xf32> to vector<2x8x1xf32>
    %267 = vector.broadcast %266 : vector<2x8x1xf32> to vector<2x8x8xf32>
    %268 = arith.subf %264, %267 : vector<2x8x8xf32>
    %269 = math.exp %268 : vector<2x8x8xf32>
    %cst_104 = arith.constant dense<0.000000e+00> : vector<2x8xf32>
    %270 = vector.multi_reduction <add>, %269, %cst_104 [2] : vector<2x8x8xf32> to vector<2x8xf32>
    %271 = vector.shape_cast %270 : vector<2x8xf32> to vector<2x8x1xf32>
    %272 = tpu.reciprocal %271 {approx = true} : vector<2x8x1xf32> -> vector<2x8x1xf32>
    %273 = vector.broadcast %272 : vector<2x8x1xf32> to vector<2x8x8xf32>
    %274 = arith.mulf %269, %273 : vector<2x8x8xf32>
    "tpu.trace_start"() <{level = 10 : i32, message = "bqk,bkd->bqd"}> : () -> ()
    %cst_105 = arith.constant dense<0.000000e+00> : vector<2x8x8xf32>
    %275 = tpu.matmul %274, %259, %cst_105 {dimension_numbers = #tpu.dot_dimension_numbers<[2], [1], [1], [2], [0, 0, 0, 1, 1, 2], [0], [0]>} : vector<2x8x8xf32>, vector<2x8x8xf32>, vector<2x8x8xf32> -> vector<2x8x8xf32>
    "tpu.trace_stop"() : () -> ()
    %276 = vector.shape_cast %275 : vector<2x8x8xf32> to vector<16x8xf32>
    %277 = vector.extract_strided_slice %252 {offsets = [0, 0], sizes = [8, 32], strides = [1, 1]} : vector<32x32xf32> to vector<8x32xf32>
    %cst_106 = arith.constant dense<0.000000e+00> : vector<16x32xf32>
    %278 = tpu.matmul %276, %277, %cst_106 {dimension_numbers = #tpu.dot_dimension_numbers<[1], [0], [0], [1], [0, 0, 1, 1], [], []>} : vector<16x8xf32>, vector<8x32xf32>, vector<16x32xf32> -> vector<16x32xf32>
    %279 = arith.addf %253, %278 : vector<16x32xf32>
    %280 = vector.extract_strided_slice %250 {offsets = [0, 8], sizes = [16, 8], strides = [1, 1]} : vector<16x96xf32> to vector<16x8xf32>
    %281 = vector.shape_cast %280 : vector<16x8xf32> to vector<2x8x8xf32>
    %282 = vector.extract_strided_slice %250 {offsets = [0, 40], sizes = [16, 8], strides = [1, 1]} : vector<16x96xf32> to vector<16x8xf32>
    %283 = vector.shape_cast %282 : vector<16x8xf32> to vector<2x8x8xf32>
    %284 = vector.extract_strided_slice %250 {offsets = [0, 72], sizes = [16, 8], strides = [1, 1]} : vector<16x96xf32> to vector<16x8xf32>
    %285 = vector.shape_cast %284 : vector<16x8xf32> to vector<2x8x8xf32>
    "tpu.trace_start"() <{level = 10 : i32, message = "bqd,bkd->bqk"}> : () -> ()
    %cst_107 = arith.constant dense<0.000000e+00> : vector<2x8x8xf32>
    %286 = tpu.matmul %281, %283, %cst_107 {dimension_numbers = #tpu.dot_dimension_numbers<[2], [2], [1], [1], [0, 0, 0, 1, 1, 1], [0], [0]>} : vector<2x8x8xf32>, vector<2x8x8xf32>, vector<2x8x8xf32> -> vector<2x8x8xf32>
    "tpu.trace_stop"() : () -> ()
    %cst_108 = arith.constant 0.353553385 : f32
    %287 = vector.broadcast %cst_108 : f32 to vector<2x8x8xf32>
    %288 = arith.mulf %286, %287 : vector<2x8x8xf32>
    %289 = vector.broadcast %5 : vector<2x1x8xf32> to vector<2x8x8xf32>
    %290 = arith.addf %288, %289 : vector<2x8x8xf32>
    %cst_109 = arith.constant dense<0xFF800000> : vector<2x8xf32>
    %291 = vector.multi_reduction <maximumf>, %290, %cst_109 [2] : vector<2x8x8xf32> to vector<2x8xf32>
    %292 = vector.shape_cast %291 : vector<2x8xf32> to vector<2x8x1xf32>
    %293 = vector.broadcast %292 : vector<2x8x1xf32> to vector<2x8x8xf32>
    %294 = arith.subf %290, %293 : vector<2x8x8xf32>
    %295 = math.exp %294 : vector<2x8x8xf32>
    %cst_110 = arith.constant dense<0.000000e+00> : vector<2x8xf32>
    %296 = vector.multi_reduction <add>, %295, %cst_110 [2] : vector<2x8x8xf32> to vector<2x8xf32>
    %297 = vector.shape_cast %296 : vector<2x8xf32> to vector<2x8x1xf32>
    %298 = tpu.reciprocal %297 {approx = true} : vector<2x8x1xf32> -> vector<2x8x1xf32>
    %299 = vector.broadcast %298 : vector<2x8x1xf32> to vector<2x8x8xf32>
    %300 = arith.mulf %295, %299 : vector<2x8x8xf32>
    "tpu.trace_start"() <{level = 10 : i32, message = "bqk,bkd->bqd"}> : () -> ()
    %cst_111 = arith.constant dense<0.000000e+00> : vector<2x8x8xf32>
    %301 = tpu.matmul %300, %285, %cst_111 {dimension_numbers = #tpu.dot_dimension_numbers<[2], [1], [1], [2], [0, 0, 0, 1, 1, 2], [0], [0]>} : vector<2x8x8xf32>, vector<2x8x8xf32>, vector<2x8x8xf32> -> vector<2x8x8xf32>
    "tpu.trace_stop"() : () -> ()
    %302 = vector.shape_cast %301 : vector<2x8x8xf32> to vector<16x8xf32>
    %303 = vector.extract_strided_slice %252 {offsets = [8, 0], sizes = [8, 32], strides = [1, 1]} : vector<32x32xf32> to vector<8x32xf32>
    %cst_112 = arith.constant dense<0.000000e+00> : vector<16x32xf32>
    %304 = tpu.matmul %302, %303, %cst_112 {dimension_numbers = #tpu.dot_dimension_numbers<[1], [0], [0], [1], [0, 0, 1, 1], [], []>} : vector<16x8xf32>, vector<8x32xf32>, vector<16x32xf32> -> vector<16x32xf32>
    %305 = arith.addf %279, %304 : vector<16x32xf32>
    %306 = vector.extract_strided_slice %250 {offsets = [0, 16], sizes = [16, 8], strides = [1, 1]} : vector<16x96xf32> to vector<16x8xf32>
    %307 = vector.shape_cast %306 : vector<16x8xf32> to vector<2x8x8xf32>
    %308 = vector.extract_strided_slice %250 {offsets = [0, 48], sizes = [16, 8], strides = [1, 1]} : vector<16x96xf32> to vector<16x8xf32>
    %309 = vector.shape_cast %308 : vector<16x8xf32> to vector<2x8x8xf32>
    %310 = vector.extract_strided_slice %250 {offsets = [0, 80], sizes = [16, 8], strides = [1, 1]} : vector<16x96xf32> to vector<16x8xf32>
    %311 = vector.shape_cast %310 : vector<16x8xf32> to vector<2x8x8xf32>
    "tpu.trace_start"() <{level = 10 : i32, message = "bqd,bkd->bqk"}> : () -> ()
    %cst_113 = arith.constant dense<0.000000e+00> : vector<2x8x8xf32>
    %312 = tpu.matmul %307, %309, %cst_113 {dimension_numbers = #tpu.dot_dimension_numbers<[2], [2], [1], [1], [0, 0, 0, 1, 1, 1], [0], [0]>} : vector<2x8x8xf32>, vector<2x8x8xf32>, vector<2x8x8xf32> -> vector<2x8x8xf32>
    "tpu.trace_stop"() : () -> ()
    %cst_114 = arith.constant 0.353553385 : f32
    %313 = vector.broadcast %cst_114 : f32 to vector<2x8x8xf32>
    %314 = arith.mulf %312, %313 : vector<2x8x8xf32>
    %315 = vector.broadcast %5 : vector<2x1x8xf32> to vector<2x8x8xf32>
    %316 = arith.addf %314, %315 : vector<2x8x8xf32>
    %cst_115 = arith.constant dense<0xFF800000> : vector<2x8xf32>
    %317 = vector.multi_reduction <maximumf>, %316, %cst_115 [2] : vector<2x8x8xf32> to vector<2x8xf32>
    %318 = vector.shape_cast %317 : vector<2x8xf32> to vector<2x8x1xf32>
    %319 = vector.broadcast %318 : vector<2x8x1xf32> to vector<2x8x8xf32>
    %320 = arith.subf %316, %319 : vector<2x8x8xf32>
    %321 = math.exp %320 : vector<2x8x8xf32>
    %cst_116 = arith.constant dense<0.000000e+00> : vector<2x8xf32>
    %322 = vector.multi_reduction <add>, %321, %cst_116 [2] : vector<2x8x8xf32> to vector<2x8xf32>
    %323 = vector.shape_cast %322 : vector<2x8xf32> to vector<2x8x1xf32>
    %324 = tpu.reciprocal %323 {approx = true} : vector<2x8x1xf32> -> vector<2x8x1xf32>
    %325 = vector.broadcast %324 : vector<2x8x1xf32> to vector<2x8x8xf32>
    %326 = arith.mulf %321, %325 : vector<2x8x8xf32>
    "tpu.trace_start"() <{level = 10 : i32, message = "bqk,bkd->bqd"}> : () -> ()
    %cst_117 = arith.constant dense<0.000000e+00> : vector<2x8x8xf32>
    %327 = tpu.matmul %326, %311, %cst_117 {dimension_numbers = #tpu.dot_dimension_numbers<[2], [1], [1], [2], [0, 0, 0, 1, 1, 2], [0], [0]>} : vector<2x8x8xf32>, vector<2x8x8xf32>, vector<2x8x8xf32> -> vector<2x8x8xf32>
    "tpu.trace_stop"() : () -> ()
    %328 = vector.shape_cast %327 : vector<2x8x8xf32> to vector<16x8xf32>
    %329 = vector.extract_strided_slice %252 {offsets = [16, 0], sizes = [8, 32], strides = [1, 1]} : vector<32x32xf32> to vector<8x32xf32>
    %cst_118 = arith.constant dense<0.000000e+00> : vector<16x32xf32>
    %330 = tpu.matmul %328, %329, %cst_118 {dimension_numbers = #tpu.dot_dimension_numbers<[1], [0], [0], [1], [0, 0, 1, 1], [], []>} : vector<16x8xf32>, vector<8x32xf32>, vector<16x32xf32> -> vector<16x32xf32>
    %331 = arith.addf %305, %330 : vector<16x32xf32>
    %332 = vector.extract_strided_slice %250 {offsets = [0, 24], sizes = [16, 8], strides = [1, 1]} : vector<16x96xf32> to vector<16x8xf32>
    %333 = vector.shape_cast %332 : vector<16x8xf32> to vector<2x8x8xf32>
    %334 = vector.extract_strided_slice %250 {offsets = [0, 56], sizes = [16, 8], strides = [1, 1]} : vector<16x96xf32> to vector<16x8xf32>
    %335 = vector.shape_cast %334 : vector<16x8xf32> to vector<2x8x8xf32>
    %336 = vector.extract_strided_slice %250 {offsets = [0, 88], sizes = [16, 8], strides = [1, 1]} : vector<16x96xf32> to vector<16x8xf32>
    %337 = vector.shape_cast %336 : vector<16x8xf32> to vector<2x8x8xf32>
    "tpu.trace_start"() <{level = 10 : i32, message = "bqd,bkd->bqk"}> : () -> ()
    %cst_119 = arith.constant dense<0.000000e+00> : vector<2x8x8xf32>
    %338 = tpu.matmul %333, %335, %cst_119 {dimension_numbers = #tpu.dot_dimension_numbers<[2], [2], [1], [1], [0, 0, 0, 1, 1, 1], [0], [0]>} : vector<2x8x8xf32>, vector<2x8x8xf32>, vector<2x8x8xf32> -> vector<2x8x8xf32>
    "tpu.trace_stop"() : () -> ()
    %cst_120 = arith.constant 0.353553385 : f32
    %339 = vector.broadcast %cst_120 : f32 to vector<2x8x8xf32>
    %340 = arith.mulf %338, %339 : vector<2x8x8xf32>
    %341 = vector.broadcast %5 : vector<2x1x8xf32> to vector<2x8x8xf32>
    %342 = arith.addf %340, %341 : vector<2x8x8xf32>
    %cst_121 = arith.constant dense<0xFF800000> : vector<2x8xf32>
    %343 = vector.multi_reduction <maximumf>, %342, %cst_121 [2] : vector<2x8x8xf32> to vector<2x8xf32>
    %344 = vector.shape_cast %343 : vector<2x8xf32> to vector<2x8x1xf32>
    %345 = vector.broadcast %344 : vector<2x8x1xf32> to vector<2x8x8xf32>
    %346 = arith.subf %342, %345 : vector<2x8x8xf32>
    %347 = math.exp %346 : vector<2x8x8xf32>
    %cst_122 = arith.constant dense<0.000000e+00> : vector<2x8xf32>
    %348 = vector.multi_reduction <add>, %347, %cst_122 [2] : vector<2x8x8xf32> to vector<2x8xf32>
    %349 = vector.shape_cast %348 : vector<2x8xf32> to vector<2x8x1xf32>
    %350 = tpu.reciprocal %349 {approx = true} : vector<2x8x1xf32> -> vector<2x8x1xf32>
    %351 = vector.broadcast %350 : vector<2x8x1xf32> to vector<2x8x8xf32>
    %352 = arith.mulf %347, %351 : vector<2x8x8xf32>
    "tpu.trace_start"() <{level = 10 : i32, message = "bqk,bkd->bqd"}> : () -> ()
    %cst_123 = arith.constant dense<0.000000e+00> : vector<2x8x8xf32>
    %353 = tpu.matmul %352, %337, %cst_123 {dimension_numbers = #tpu.dot_dimension_numbers<[2], [1], [1], [2], [0, 0, 0, 1, 1, 2], [0], [0]>} : vector<2x8x8xf32>, vector<2x8x8xf32>, vector<2x8x8xf32> -> vector<2x8x8xf32>
    "tpu.trace_stop"() : () -> ()
    %354 = vector.shape_cast %353 : vector<2x8x8xf32> to vector<16x8xf32>
    %355 = vector.extract_strided_slice %252 {offsets = [24, 0], sizes = [8, 32], strides = [1, 1]} : vector<32x32xf32> to vector<8x32xf32>
    %cst_124 = arith.constant dense<0.000000e+00> : vector<16x32xf32>
    %356 = tpu.matmul %354, %355, %cst_124 {dimension_numbers = #tpu.dot_dimension_numbers<[1], [0], [0], [1], [0, 0, 1, 1], [], []>} : vector<16x8xf32>, vector<8x32xf32>, vector<16x32xf32> -> vector<16x32xf32>
    %357 = arith.addf %331, %356 : vector<16x32xf32>
    %c1_125 = arith.constant 1 : index
    %c0_126 = arith.constant 0 : index
    %c0_127 = arith.constant 0 : index
    %358 = vector.load %arg10[%c1_125, %c0_126, %c0_127] : memref<2x1x32xf32, #tpu.memory_space<vmem>>, vector<1x1x32xf32>
    %359 = vector.shape_cast %358 : vector<1x1x32xf32> to vector<1x32xf32>
    %360 = vector.broadcast %359 : vector<1x32xf32> to vector<16x32xf32>
    %361 = arith.addf %357, %360 : vector<16x32xf32>
    %362 = arith.addf %243, %361 : vector<16x32xf32>
    %c1_128 = arith.constant 1 : index
    %c0_129 = arith.constant 0 : index
    %c0_130 = arith.constant 0 : index
    %363 = vector.load %arg11[%c1_128, %c0_129, %c0_130] : memref<2x2x32xf32, #tpu.memory_space<vmem>>, vector<1x2x32xf32>
    %364 = vector.shape_cast %363 : vector<1x2x32xf32> to vector<2x32xf32>
    %365 = vector.extract_strided_slice %364 {offsets = [0, 0], sizes = [1, 32], strides = [1, 1]} : vector<2x32xf32> to vector<1x32xf32>
    %366 = vector.extract_strided_slice %364 {offsets = [1, 0], sizes = [1, 32], strides = [1, 1]} : vector<2x32xf32> to vector<1x32xf32>
    %cst_131 = arith.constant dense<0.000000e+00> : vector<16xf32>
    %367 = vector.multi_reduction <add>, %362, %cst_131 [1] : vector<16x32xf32> to vector<16xf32>
    %368 = vector.shape_cast %367 : vector<16xf32> to vector<16x1xf32>
    %cst_132 = arith.constant 3.200000e+01 : f32
    %369 = vector.broadcast %cst_132 : f32 to vector<16x1xf32>
    %370 = arith.divf %368, %369 : vector<16x1xf32>
    %371 = vector.broadcast %370 : vector<16x1xf32> to vector<16x32xf32>
    %372 = arith.subf %362, %371 : vector<16x32xf32>
    %373 = arith.mulf %372, %372 : vector<16x32xf32>
    %cst_133 = arith.constant dense<0.000000e+00> : vector<16xf32>
    %374 = vector.multi_reduction <add>, %373, %cst_133 [1] : vector<16x32xf32> to vector<16xf32>
    %375 = vector.shape_cast %374 : vector<16xf32> to vector<16x1xf32>
    %cst_134 = arith.constant 3.200000e+01 : f32
    %376 = vector.broadcast %cst_134 : f32 to vector<16x1xf32>
    %377 = arith.divf %375, %376 : vector<16x1xf32>
    %378 = vector.broadcast %370 : vector<16x1xf32> to vector<16x32xf32>
    %379 = arith.subf %362, %378 : vector<16x32xf32>
    %cst_135 = arith.constant 9.99999996E-13 : f32
    %380 = vector.broadcast %cst_135 : f32 to vector<16x1xf32>
    %381 = arith.addf %377, %380 : vector<16x1xf32>
    %382 = math.rsqrt %381 : vector<16x1xf32>
    %383 = vector.broadcast %382 : vector<16x1xf32> to vector<16x32xf32>
    %384 = arith.mulf %379, %383 : vector<16x32xf32>
    %385 = vector.broadcast %365 : vector<1x32xf32> to vector<16x32xf32>
    %386 = arith.mulf %384, %385 : vector<16x32xf32>
    %387 = vector.broadcast %366 : vector<1x32xf32> to vector<16x32xf32>
    %388 = arith.addf %386, %387 : vector<16x32xf32>
    %c1_136 = arith.constant 1 : index
    %c0_137 = arith.constant 0 : index
    %c0_138 = arith.constant 0 : index
    %389 = vector.load %arg12[%c1_136, %c0_137, %c0_138] : memref<2x32x128xf32, #tpu.memory_space<vmem>>, vector<1x32x128xf32>
    %390 = vector.shape_cast %389 : vector<1x32x128xf32> to vector<32x128xf32>
    %cst_139 = arith.constant dense<0.000000e+00> : vector<16x128xf32>
    %391 = tpu.matmul %388, %390, %cst_139 {dimension_numbers = #tpu.dot_dimension_numbers<[1], [0], [0], [1], [0, 0, 1, 1], [], []>} : vector<16x32xf32>, vector<32x128xf32>, vector<16x128xf32> -> vector<16x128xf32>
    %c1_140 = arith.constant 1 : index
    %c0_141 = arith.constant 0 : index
    %c0_142 = arith.constant 0 : index
    %392 = vector.load %arg13[%c1_140, %c0_141, %c0_142] : memref<2x1x128xf32, #tpu.memory_space<vmem>>, vector<1x1x128xf32>
    %393 = vector.shape_cast %392 : vector<1x1x128xf32> to vector<1x128xf32>
    %394 = vector.broadcast %393 : vector<1x128xf32> to vector<16x128xf32>
    %395 = arith.addf %391, %394 : vector<16x128xf32>
    %396 = arith.mulf %395, %395 : vector<16x128xf32>
    %397 = arith.mulf %395, %396 : vector<16x128xf32>
    %cst_143 = arith.constant 4.471500e-02 : f32
    %398 = vector.broadcast %cst_143 : f32 to vector<16x128xf32>
    %399 = arith.mulf %398, %397 : vector<16x128xf32>
    %400 = arith.addf %395, %399 : vector<16x128xf32>
    %cst_144 = arith.constant 0.797884583 : f32
    %401 = vector.broadcast %cst_144 : f32 to vector<16x128xf32>
    %402 = arith.mulf %401, %400 : vector<16x128xf32>
    %403 = math.tanh %402 : vector<16x128xf32>
    %cst_145 = arith.constant 1.000000e+00 : f32
    %404 = vector.broadcast %cst_145 : f32 to vector<16x128xf32>
    %405 = arith.addf %404, %403 : vector<16x128xf32>
    %cst_146 = arith.constant 5.000000e-01 : f32
    %406 = vector.broadcast %cst_146 : f32 to vector<16x128xf32>
    %407 = arith.mulf %406, %405 : vector<16x128xf32>
    %408 = arith.mulf %395, %407 : vector<16x128xf32>
    %c1_147 = arith.constant 1 : index
    %c0_148 = arith.constant 0 : index
    %c0_149 = arith.constant 0 : index
    %409 = vector.load %arg14[%c1_147, %c0_148, %c0_149] : memref<2x128x32xf32, #tpu.memory_space<vmem>>, vector<1x128x32xf32>
    %410 = vector.shape_cast %409 : vector<1x128x32xf32> to vector<128x32xf32>
    %cst_150 = arith.constant dense<0.000000e+00> : vector<16x32xf32>
    %411 = tpu.matmul %408, %410, %cst_150 {dimension_numbers = #tpu.dot_dimension_numbers<[1], [0], [0], [1], [0, 0, 1, 1], [], []>} : vector<16x128xf32>, vector<128x32xf32>, vector<16x32xf32> -> vector<16x32xf32>
    %c1_151 = arith.constant 1 : index
    %c0_152 = arith.constant 0 : index
    %c0_153 = arith.constant 0 : index
    %412 = vector.load %arg15[%c1_151, %c0_152, %c0_153] : memref<2x1x32xf32, #tpu.memory_space<vmem>>, vector<1x1x32xf32>
    %413 = vector.shape_cast %412 : vector<1x1x32xf32> to vector<1x32xf32>
    %414 = vector.broadcast %413 : vector<1x32xf32> to vector<16x32xf32>
    %415 = arith.addf %411, %414 : vector<16x32xf32>
    %416 = arith.addf %388, %415 : vector<16x32xf32>
    %c1_154 = arith.constant 1 : index
    %c0_155 = arith.constant 0 : index
    %c0_156 = arith.constant 0 : index
    %417 = vector.load %arg16[%c1_154, %c0_155, %c0_156] : memref<2x2x32xf32, #tpu.memory_space<vmem>>, vector<1x2x32xf32>
    %418 = vector.shape_cast %417 : vector<1x2x32xf32> to vector<2x32xf32>
    %419 = vector.extract_strided_slice %418 {offsets = [0, 0], sizes = [1, 32], strides = [1, 1]} : vector<2x32xf32> to vector<1x32xf32>
    %420 = vector.extract_strided_slice %418 {offsets = [1, 0], sizes = [1, 32], strides = [1, 1]} : vector<2x32xf32> to vector<1x32xf32>
    %cst_157 = arith.constant dense<0.000000e+00> : vector<16xf32>
    %421 = vector.multi_reduction <add>, %416, %cst_157 [1] : vector<16x32xf32> to vector<16xf32>
    %422 = vector.shape_cast %421 : vector<16xf32> to vector<16x1xf32>
    %cst_158 = arith.constant 3.200000e+01 : f32
    %423 = vector.broadcast %cst_158 : f32 to vector<16x1xf32>
    %424 = arith.divf %422, %423 : vector<16x1xf32>
    %425 = vector.broadcast %424 : vector<16x1xf32> to vector<16x32xf32>
    %426 = arith.subf %416, %425 : vector<16x32xf32>
    %427 = arith.mulf %426, %426 : vector<16x32xf32>
    %cst_159 = arith.constant dense<0.000000e+00> : vector<16xf32>
    %428 = vector.multi_reduction <add>, %427, %cst_159 [1] : vector<16x32xf32> to vector<16xf32>
    %429 = vector.shape_cast %428 : vector<16xf32> to vector<16x1xf32>
    %cst_160 = arith.constant 3.200000e+01 : f32
    %430 = vector.broadcast %cst_160 : f32 to vector<16x1xf32>
    %431 = arith.divf %429, %430 : vector<16x1xf32>
    %432 = vector.broadcast %424 : vector<16x1xf32> to vector<16x32xf32>
    %433 = arith.subf %416, %432 : vector<16x32xf32>
    %cst_161 = arith.constant 9.99999996E-13 : f32
    %434 = vector.broadcast %cst_161 : f32 to vector<16x1xf32>
    %435 = arith.addf %431, %434 : vector<16x1xf32>
    %436 = math.rsqrt %435 : vector<16x1xf32>
    %437 = vector.broadcast %436 : vector<16x1xf32> to vector<16x32xf32>
    %438 = arith.mulf %433, %437 : vector<16x32xf32>
    %439 = vector.broadcast %419 : vector<1x32xf32> to vector<16x32xf32>
    %440 = arith.mulf %438, %439 : vector<16x32xf32>
    %441 = vector.broadcast %420 : vector<1x32xf32> to vector<16x32xf32>
    %442 = arith.addf %440, %441 : vector<16x32xf32>
    %443 = vector.broadcast %1 : vector<16x1xf32> to vector<16x32xf32>
    %444 = arith.mulf %442, %443 : vector<16x32xf32>
    %445 = tpu.iota {dimensions = array<i32: 1>} : vector<2x8x8xi32>
    %c0_162 = arith.constant 0 : index
    %c0_163 = arith.constant 0 : index
    %c0_164 = arith.constant 0 : index
    %446 = vector.load %arg3[%c0_162, %c0_163, %c0_164] : memref<2x1x8xi32, #tpu.memory_space<vmem>>, vector<2x1x8xi32>
    %447 = vector.broadcast %446 : vector<2x1x8xi32> to vector<2x8x8xi32>
    %448 = arith.cmpi eq, %447, %445 : vector<2x8x8xi32>
    %449 = arith.extui %448 : vector<2x8x8xi1> to vector<2x8x8xi32>
    %450 = arith.sitofp %449 : vector<2x8x8xi32> to vector<2x8x8xf32>
    %451 = vector.shape_cast %444 : vector<16x32xf32> to vector<2x8x32xf32>
    %cst_165 = arith.constant dense<0.000000e+00> : vector<2x8x32xf32>
    %452 = tpu.matmul %450, %451, %cst_165 {dimension_numbers = #tpu.dot_dimension_numbers<[2], [1], [1], [2], [0, 0, 0, 1, 1, 2], [0], [0]>} : vector<2x8x8xf32>, vector<2x8x32xf32>, vector<2x8x32xf32> -> vector<2x8x32xf32>
    %cst_166 = arith.constant dense<0.000000e+00> : vector<2x8xf32>
    %453 = vector.multi_reduction <add>, %450, %cst_166 [2] : vector<2x8x8xf32> to vector<2x8xf32>
    %454 = vector.shape_cast %453 : vector<2x8xf32> to vector<2x8x1xf32>
    %cst_167 = arith.constant 1.000000e+00 : f32
    %455 = vector.broadcast %cst_167 : f32 to vector<2x8x1xf32>
    %456 = arith.maximumf %454, %455 : vector<2x8x1xf32>
    %457 = vector.broadcast %456 : vector<2x8x1xf32> to vector<2x8x32xf32>
    %458 = arith.divf %452, %457 : vector<2x8x32xf32>
    %459 = vector.broadcast %0 : vector<2x1x8xf32> to vector<2x8x8xf32>
    %460 = arith.mulf %450, %459 : vector<2x8x8xf32>
    %cst_168 = arith.constant dense<0xFF800000> : vector<2x8xf32>
    %461 = vector.multi_reduction <maximumf>, %460, %cst_168 [2] : vector<2x8x8xf32> to vector<2x8xf32>
    %462 = vector.shape_cast %461 : vector<2x8xf32> to vector<2x8x1xf32>
    %463 = vector.shape_cast %458 : vector<2x8x32xf32> to vector<16x32xf32>
    %c0_169 = arith.constant 0 : index
    %c0_170 = arith.constant 0 : index
    %464 = vector.load %arg17[%c0_169, %c0_170] : memref<32x128xf32, #tpu.memory_space<vmem>>, vector<32x128xf32>
    %cst_171 = arith.constant dense<0.000000e+00> : vector<16x128xf32>
    %465 = tpu.matmul %463, %464, %cst_171 {dimension_numbers = #tpu.dot_dimension_numbers<[1], [0], [0], [1], [0, 0, 1, 1], [], []>} : vector<16x32xf32>, vector<32x128xf32>, vector<16x128xf32> -> vector<16x128xf32>
    %c0_172 = arith.constant 0 : index
    %c0_173 = arith.constant 0 : index
    %466 = vector.load %arg18[%c0_172, %c0_173] : memref<1x128xf32, #tpu.memory_space<vmem>>, vector<1x128xf32>
    %467 = vector.broadcast %466 : vector<1x128xf32> to vector<16x128xf32>
    %468 = arith.addf %465, %467 : vector<16x128xf32>
    %469 = vector.shape_cast %468 : vector<16x128xf32> to vector<2x8x128xf32>
    %470 = tpu.iota {dimensions = array<i32: 2>} : vector<2x8x128xi32>
    %c6_i32 = arith.constant 6 : i32
    %471 = vector.broadcast %c6_i32 : i32 to vector<2x8x128xi32>
    %472 = arith.cmpi eq, %470, %471 : vector<2x8x128xi32>
    %cst_174 = arith.constant 0.000000e+00 : f32
    %473 = vector.shape_cast %462 : vector<2x8x1xf32> to vector<2x8x1xf32>
    %474 = vector.broadcast %473 : vector<2x8x1xf32> to vector<2x8x128xf32>
    %475 = vector.broadcast %cst_174 : f32 to vector<2x8x128xf32>
    %476 = arith.select %472, %474, %475 : vector<2x8x128xi1>, vector<2x8x128xf32>
    %477 = arith.addf %469, %476 : vector<2x8x128xf32>
    %c0_175 = arith.constant 0 : index
    %c0_176 = arith.constant 0 : index
    %c0_177 = arith.constant 0 : index
    %478 = vector.load %arg19[%c0_175, %c0_176, %c0_177] : memref<2x8x128xf32, #tpu.memory_space<vmem>>, vector<2x8x128xf32>
    tpu.vector_store %arg19[%c0_175, %c0_176, %c0_177], %477 {strides = array<i32>} : memref<2x8x128xf32, #tpu.memory_space<vmem>>, vector<2x8x128xf32>,
    return
  }
}

</mosaic_0001>

<bundles_post_ra>
// kernel: gec_bert_2decisions_forward.1
= control target key start
LH: loop header
LB: loop body
LE: loop exit
PB: predicated region body
PF: predicated region fallthrough
CT: control target
= control target key end

     0   :  { %v5565_v0 = vmov 0   ;;  %vm102_vm0 = vcmask 1041408   ;;  %v5566_v13 = vmov 0.0   ;;  %v70_v14 = vlaneseq  ;;  %s5568_s26 = smov 96   ;;  %s5569_s30 = smov 120   ;;  %s6403_s0 = inlined_call_operand.vmem [shape: s32[16,1], index: 0, kind: input, shape index: {}]   ;;  %s6404_s4 = inlined_call_operand.vmem [shape: f32[50,32], index: 4, kind: input, shape index: {}]   ;;  %s6405_s5 = inlined_call_operand.vmem [shape: f32[16,32], index: 5, kind: input, shape index: {}]   ;;  %s6406_s2 = inlined_call_operand.vmem [shape: f32[16,1], index: 2, kind: input, shape index: {}]   ;;  %s6407_s7 = inlined_call_operand.vmem [shape: f32[2,32,96], index: 7, kind: input, shape index: {}]   ;;  %s6408_s6 = inlined_call_operand.vmem [shape: f32[2,32], index: 6, kind: input, shape index: {}]   ;;  %s6409_s8 = inlined_call_operand.vmem [shape: f32[2,1,96], index: 8, kind: input, shape index: {}]   ;;  %s6410_s1 = inlined_call_operand.vmem [shape: f32[2,1,8], index: 1, kind: input, shape index: {}]   ;;  %s6411_s9 = inlined_call_operand.vmem [shape: f32[2,32,32], index: 9, kind: input, shape index: {}]   ;;  %s6412_s10 = inlined_call_operand.vmem [shape: f32[2,1,32], index: 10, kind: input, shape index: {}]   ;;  %s6413_s12 = inlined_call_operand.vmem [shape: f32[2,32,128], index: 12, kind: input, shape index: {}]   ;;  %s6414_s11 = inlined_call_operand.vmem [shape: f32[2,2,32], index: 11, kind: input, shape index: {}]   ;;  %s6415_s14 = inlined_call_operand.vmem [shape: f32[2,128,32], index: 14, kind: input, shape index: {}]   ;;  %s6416_s13 = inlined_call_operand.vmem [shape: f32[2,1,128], index: 13, kind: input, shape index: {}]   ;;  %s6417_s15 = inlined_call_operand.vmem [shape: f32[2,1,32], index: 15, kind: input, shape index: {}]   ;;  %s6418_s16 = inlined_call_operand.vmem [shape: f32[2,2,32], index: 16, kind: input, shape index: {}]   ;;  %s6419_s3 = inlined_call_operand.vmem [shape: s32[2,1,8], index: 3, kind: input, shape index: {}]   ;;  %s6420_s17 = inlined_call_operand.vmem [shape: f32[32,128], index: 17, kind: input, shape index: {}]   ;;  %s6421_s18 = inlined_call_operand.vmem [shape: f32[1,128], index: 18, kind: input, shape index: {}]   ;;  %s6422_s19 = inlined_call_operand.vmem [shape: f32[2,8,128], index: 19, kind: output, shape index: {}]  }
   0x1   :  { %6437 = sst [smem:[#allocation2_spill]] %s6403_s0  ;;  %5463 = vset.pattern.permute.xlu0 %v5565_v0  ;;  %5464 = vset.pattern.permute.xlu1 %v5565_v0  ;;  %vm95_vm1 = vcmask 408576   ;;  %vm182_vm4 = vcmask 261120   ;;  %v234_v40 = vld [vmem:[%s6407_s7] sm:$0xff]  ;;  %v235_v41 = vld [vmem:[%s6407_s7 + $0x8] sm:$0xff]  ;;  %v236_v43 = vld [vmem:[%s6407_s7 + $0x10] sm:$0xff] }
   0x2   :  { %6438 = sst [smem:[#allocation3_spill]] %s6404_s4  ;;  %s6441_s20 = sld [smem:[#allocation2_spill]]  ;;  %v5707_v15 = vand.u32 127, %v70_v14  ;;  %v5333_v42 = vpack.c.bf16 %v235_v41, %v234_v40  ;;  %v237_v44 = vld [vmem:[%s6407_s7 + $0x18] sm:$0xff]  ;;  %v5742_v51 = vshrl.u32 %v70_v14, 7  ;;  %vm5567_vm5 = vmmov 0  }
   0x3   :  { %6439 = sst [smem:[#allocation4_spill]] %s6405_s5  ;;  %s6442_s22 = sld [smem:[#allocation3_spill]]  ;;  %v5337_v45 = vpack.c.bf16 %v237_v44, %v236_v43  ;;  %v181_v54 = vld [vmem:[%s6408_s6] sm:$0x3]  ;;  %vm333_vm6 = vcmask 64512  }
   0x4   :  { %6440 = sst [smem:[#allocation5_spill]] %s6406_s2  ;;  %s6443_s23 = sld [smem:[#allocation4_spill]]  ;;  %5334 = vmatprep.subr.bf16.mxu1 %v5333_v42  ;;  %v5745_v53 = vsub.s32 0, %v5742_v51  ;;  %v5751_v55 = vsub.s32 1, %v5742_v51  ;;  %v62_v14 = vld [vmem:[%s6410_s1] sm:$0x1] }
   0x5   :  { %s6444_s27 = sld [smem:[#allocation5_spill]]  ;;  %5336 = vmatpush3.bf16.msra.mxu1 %v5333_v42  ;;  %s5570_s21 = smov 64   ;;  %vm4663_vm9 = vcmp.eq.s32.totalorder %v5707_v15, 6 }
   0x6   :  { %5338 = vmatprep.subr.bf16.mxu1 %v5337_v45  ;;  %v213_v56 = vrot.slane %v181_v54, %v5745_v53  ;;  %v219_v58 = vrot.slane %v181_v54, %v5751_v55  ;;  %s5571_s4 = smov 80   ;;  %s5572_s5 = smov 88  }
   0x7   :  { %s6431_s24 = smov 72   ;;  %s6429_s25 = smov 104  }
   0x8   :  { %v72_v1 = vld [vmem:[%s6441_s20] sm:$0xff]  ;;  %v73_v6 = vld [vmem:[%s6441_s20 + $0x8] sm:$0xff]  ;;  %s6435_s20 = smov 56   ;;  %s6427_s6 = smov 40  }
   0x9   :  { %v86_v2 = vld [vmem:[%s6442_s22] sm:$0xff]  ;;  %75 = vperm.xlu0 %5463, %v72_v1   ;;  %v87_v3 = vld [vmem:[%s6442_s22 + $0x8] sm:$0xff]  ;;  %v88_v4 = vld [vmem:[%s6442_s22 + $0x10] sm:$0xff]  ;;  %5340 = vmatpush3.bf16.msra.mxu1 %v5337_v45  ;;  %s6449_s2 = smov 40  }
   0xa   :  { %v89_v5 = vld [vmem:[%s6442_s22 + $0x18] sm:$0xff]  ;;  %v5321_v7 = vpack.c.bf16 %v87_v3, %v86_v2  ;;  %v90_v9 = vld [vmem:[%s6442_s22 + $0x20] sm:$0xff]  ;;  %v91_v10 = vld [vmem:[%s6442_s22 + $0x28] sm:$0xff]  ;;  %4997 = vmatprep.subr.mxu1 %v5566_v13 }
   0xb   :  { %v5325_v8 = vpack.c.bf16 %v89_v5, %v88_v4  ;;  %v5329_v11 = vpack.c.bf16 %v91_v10, %v90_v9  ;;  %v92_v12 = vld [vmem:[%s6442_s22 + $0x30] sm:$0x3]  ;;  %v93_v20 = vld [vmem:[%s6443_s23] sm:$0xff]  ;;  %v94_v22 = vld [vmem:[%s6443_s23 + $0x8] sm:$0xff]  ;;  %s5574_s22 = smov 112   ;;  %s6433_s23 = smov 48  }
   0xc   :  { %5322 = vmatprep.subr.bf16.mxu0 %v5321_v7  ;;  %v64_v38 = vld [vmem:[%s6444_s27] sm:$0xff]  ;;  %v65_v39 = vld [vmem:[%s6444_s27 + $0x8] sm:$0xff] }
   0xd   :  { %78 = vperm.xlu0 %5463, %v73_v6   ;;  %5324 = vmatpush3.bf16.msra.mxu0 %v5321_v7  ;;  %v4679_v6 = vld [vmem:[%s6409_s8] ss:$0 sm:$0xff] }
   0xe   :  { %5326 = vmatprep.subr.bf16.mxu0 %v5325_v8 }
  0x11   :  { %5328 = vmatpush3.bf16.msra.mxu0 %v5325_v8 }
  0x12   :  { %5330 = vmatprep.subr.bf16.mxu0 %v5329_v11 }
  0x15   :  { %5332 = vmatpush3.bf16.msra.mxu0 %v5329_v11 }
  0x16   :  { %4981 = vmatprep.subr.msk.mxu0 %vm102_vm0, %v92_v12 }
  0x19   :  { %4982 = vmatpush3.msk.msra.mxu0 %vm102_vm0, %v92_v12 }
  0x1a   :  { %5027 = vmatprep.subr.mxu0 %v5566_v13 }
  0x88   :  { %v76_v16 = vpop.permute.xlu0 %75 }
  0x89   :  { %vm80_vm2 = vcmp.eq.s32.totalorder %v76_v16, %v5707_v15  ;;  %v66_v16 = vsub.f32 1.0, %v62_v14 }
  0x8a   :  { %v4674_v17 = vsel %vm80_vm2, 1.0, %v5566_v13 }
  0x8b   :  { %4983 = vmatprep.mubr.msk.f32.mxu0 %vm95_vm1, %v4674_v17  ;;  %v63_v17 = vld [vmem:[%s6410_s1 + $0x1] sm:$0x1] }
  0x8c   :  { %v79_v18 = vpop.permute.xlu0 %78 }
  0x8d   :  { %vm81_vm3 = vcmp.eq.s32.totalorder %v79_v18, %v5707_v15  ;;  %v68_v18 = vmul.f32 -1e+09, %v66_v16 }
  0x8e   :  { %v4675_v19 = vsel %vm81_vm3, 1.0, %v5566_v13 }
  0x8f   :  { %4984 = vmatmul.mubr.msk.f32.vlgmr.msra.gmra.mrb[0].mxu0 %vm95_vm1, %v4675_v19  ;;  %v67_v19 = vsub.f32 1.0, %v63_v17 }
  0x90   :  { %5029 = vmatprep.mubr.msk.f32.mxu0 %vm5567_vm5, %v5566_v13 }
 0x162   :  { %v4985_v21 = vpop.f32.mrb[0].mxu0 }
 0x163   :  { %v172_v23 = vpop.f32.mrb[1].mxu0  ;;  %v178_v25 = vadd.f32 %v4985_v21, %v94_v22  ;;  %v69_v21 = vmul.f32 -1e+09, %v67_v19 }
 0x164   :  { %v173_v24 = vadd.f32 %v172_v23, %v93_v20  ;;  %v5803_v20 = vrot.slane %v68_v18, %v5745_v53 }
 0x165   :  { %v186_v27 = vsel %vm182_vm4, %v178_v25, 0.0 }
 0x166   :  { %v183_v26 = vsel %vm182_vm4, %v173_v24, 0.0 }
 0x167   :  { %184 = vadd.xlane.f32.xlu1 %v183_v26  ;;  %v5807_v26 = vrot.slane %v69_v21, %v5745_v53 }
 0x16b   :  { %187 = vadd.xlane.f32.xlu1 %v186_v27 }
 0x1f4   :  { %v185_v28 = vpop.xlane.xlu1 %184 }
 0x1f5   :  { %v190_v29 = vmul.f32 0.03125, %v185_v28 }
 0x1f7   :  { %v192_v30 = vsub.f32 %v173_v24, %v190_v29 }
 0x1f8   :  { %v188_v31 = vpop.xlane.xlu1 %187 }
 0x1f9   :  { %v191_v32 = vmul.f32 0.03125, %v188_v31  ;;  %v194_v33 = vmul.f32 %v192_v30, %v192_v30 }
 0x1fb   :  { %v193_v34 = vsub.f32 %v178_v25, %v191_v32  ;;  %v196_v35 = vsel %vm182_vm4, %v194_v33, 0.0 }
 0x1fc   :  { %197 = vadd.xlane.f32.xlu0 %v196_v35 }
 0x1fd   :  { %v195_v36 = vmul.f32 %v193_v34, %v193_v34 }
 0x1ff   :  { %v199_v37 = vsel %vm182_vm4, %v195_v36, 0.0 }
 0x200   :  { %200 = vadd.xlane.f32.xlu1 %v199_v37 }
 0x211   :  { %224 = vperm.xlu1 %5464, %v64_v38  }
 0x215   :  { %229 = vperm.xlu1 %5464, %v65_v39  }
 0x289   :  { %v198_v46 = vpop.xlane.xlu0 %197 }
 0x28a   :  { %v202_v47 = vmul.f32 0.03125, %v198_v46 }
 0x28c   :  { %v204_v48 = vadd.f32 1e-12, %v202_v47 }
 0x28d   :  { %v201_v49 = vpop.xlane.xlu1 %200 }
 0x28e   :  { %5465 = vrsqrt.f32 %v204_v48  ;;  %v203_v50 = vmul.f32 0.03125, %v201_v49 }
 0x290   :  { %v205_v52 = vadd.f32 1e-12, %v203_v50 }
 0x291   :  { %v5755_v62 = vpop.permute.xlu1 %224 }
 0x292   :  { %5467 = vrsqrt.f32 %v205_v52 }
 0x295   :  { %v5762_v4 = vpop.permute.xlu1 %229 }
 0x298   :  { %v5466_v57 = vpop.eup %5465 }
 0x299   :  { %v208_v59 = vmul.f32 %v5466_v57, %v192_v30 }
 0x29b   :  { %v214_v60 = vmul.f32 %v213_v56, %v208_v59 }
 0x29c   :  { %v5468_v61 = vpop.eup %5467 }
 0x29d   :  { %v209_v63 = vmul.f32 %v5468_v61, %v193_v34  ;;  %v220_v0 = vadd.f32 %v219_v58, %v214_v60 }
 0x29f   :  { %v215_v1 = vmul.f32 %v213_v56, %v209_v63  ;;  %v5758_v2 = vmul.f32 %v5755_v62, %v220_v0 }
 0x2a1   :  { %v221_v3 = vadd.f32 %v219_v58, %v215_v1  ;;  %4994 = vmatprep.mubr.msk.f32.mxu1 %vm182_vm4, %v5758_v2 }
 0x2a3   :  { %v5765_v5 = vmul.f32 %v5762_v4, %v221_v3 }
 0x2a5   :  { %4995 = vmatmul.mubr.msk.f32.vlgmr.msra.gmra.mrb[0].mxu1 %vm182_vm4, %v5765_v5 }
 0x2a6   :  { %4999 = vmatprep.mubr.msk.f32.mxu1 %vm5567_vm5, %v5566_v13 }
 0x378   :  { %v4996_v7 = vpop.f32.mrb[0].mxu1 }
 0x379   :  { %v317_v8 = vpop.f32.mrb[1].mxu1  ;;  %v5780_v10 = vadd.f32 %v4996_v7, %v4679_v6 }
 0x37a   :  { %v5776_v9 = vadd.f32 %v4679_v6, %v317_v8 }
 0x37c   :  { %331 = vrot.lane.b32.xlu1 %v5776_v9, %s5568_s26 }
 0x380   :  { %409 = vrot.lane.b32.xlu1 %v5780_v10, %s5568_s26 }
 0x3ee   :  { %v332_v11 = vpop.permute.xlu1 %331 }
 0x3ef   :  { %4998 = vmatpush3.xpose.msk.msra.mxu1 %vm333_vm6, %v332_v11 }
 0x3f0   :  { %5002 = vmatprep.subr.mxu1 %v5566_v13 }
 0x3f2   :  { %5000 = vmatmul.mubr.msk.f32.vlgmr.msra.gmra.mrb[2].mxu1 %vm333_vm6, %v5776_v9  ;;  %v410_v12 = vpop.permute.xlu1 %409 }
 0x3f3   :  { %5003 = vmatpush3.xpose.msk.msra.mxu1 %vm333_vm6, %v410_v12  ;;  %5004 = vmatprep.mubr.msk.f32.mxu1 %vm5567_vm5, %v5566_v13 }
 0x3f4   :  { %5007 = vmatprep.subr.mxu1 %v5566_v13 }
 0x3f6   :  { %5005 = vmatmul.mubr.msk.f32.vlgmr.msra.gmra.mrb[4].mxu1 %vm333_vm6, %v5780_v10 }
 0x3f7   :  { %5009 = vmatprep.mubr.msk.f32.mxu1 %vm5567_vm5, %v5566_v13 }
 0x4c5   :  { %v404_v22 = vpop.f32.mrb[2].mxu1 }
 0x4c6   :  { %v485_v23 = vmul.f32 0.35355338, %v404_v22  ;;  %v5001_v24 = vpop.f32.mrb[3].mxu1 }
 0x4c8   :  { %v499_v25 = vadd.f32 %v5803_v20, %v485_v23 }
 0x4c9   :  { %v481_v27 = vpop.f32.mrb[4].mxu1 }
 0x4ca   :  { %v486_v28 = vmul.f32 0.35355338, %v481_v27  ;;  %v5006_v29 = vpop.f32.mrb[5].mxu1  ;;  %v501_v30 = vsel %vm333_vm6, %v499_v25, -inf }
 0x4cb   :  { %502 = vmax.xlane.f32.xlu0 %v501_v30 }
 0x4cc   :  { %v500_v31 = vadd.f32 %v5807_v26, %v486_v28 }
 0x4ce   :  { %v504_v32 = vsel %vm333_vm6, %v500_v31, -inf }
 0x4cf   :  { %505 = vmax.xlane.f32.xlu1 %v504_v32 }
 0x4e0   :  { %675 = vrot.lane.b32.xlu1 %v5776_v9, %s5569_s30 }
 0x4e1   :  { %523 = vrot.lane.b32.xlu0 %v5776_v9, %s5570_s21 }
 0x4e4   :  { %1173 = vrot.lane.b32.xlu1 %v5776_v9, %s5571_s4 }
 0x4e5   :  { %599 = vrot.lane.b32.xlu0 %v5780_v10, %s5570_s21 }
 0x558   :  { %v503_v33 = vpop.xlane.xlu0 %502 }
 0x559   :  { %v507_v34 = vsub.f32 %v499_v25, %v503_v33 }
 0x55b   :  { %v509_v35 = vmul.f32 1.442695, %v507_v34 }
 0x55c   :  { %v524_v36 = vpop.permute.xlu0 %523  ;;  %v506_v39 = vpop.xlane.xlu1 %505 }
 0x55d   :  { %5469 = vpow2.f32 %v509_v35  ;;  %5008 = vmatpush3.msra.mxu1 %v524_v36  ;;  %v508_v40 = vsub.f32 %v500_v31, %v506_v39 }
 0x55e   :  { %5012 = vmatprep.subr.mxu1 %v5566_v13 }
 0x55f   :  { %v511_v41 = vmul.f32 1.442695, %v508_v40  ;;  %v327_v40 = vld [vmem:[%s6411_s9 + $0x8] sm:$0xff] }
 0x560   :  { %v600_v44 = vpop.permute.xlu0 %599  ;;  %v676_v56 = vpop.permute.xlu1 %675 }
 0x561   :  { %5471 = vpow2.f32 %v511_v41  ;;  %v326_v41 = vld [vmem:[%s6411_s9] sm:$0xff] }
 0x564   :  { %v1174_v32 = vpop.permute.xlu1 %1173 }
 0x567   :  { %v5470_v37 = vpop.eup %5469 }
 0x568   :  { %v513_v38 = vsel %vm333_vm6, %v5470_v37, 0.0 }
 0x569   :  { %514 = vadd.xlane.f32.xlu0 %v513_v38 }
 0x56b   :  { %v5472_v42 = vpop.eup %5471 }
 0x56c   :  { %v516_v43 = vsel %vm333_vm6, %v5472_v42, 0.0 }
 0x57f   :  { %677 = vrot.lane.b32.xlu0 %v5776_v9, %s5572_s5 }
 0x59e   :  { %517 = vadd.xlane.f32.xlu0 %v516_v43 }
 0x5b4   :  { %755 = vrot.lane.b32.xlu0 %v5780_v10, %s5572_s5 }
 0x5b8   :  { %753 = vrot.lane.b32.xlu0 %v5780_v10, %s5569_s30 }
 0x5f6   :  { %v515_v45 = vpop.xlane.xlu0 %514 }
 0x5f7   :  { %5473 = vrcp.f32 %v515_v45 }
 0x5fa   :  { %v678_v48 = vpop.permute.xlu0 %677 }
 0x601   :  { %v5474_v46 = vpop.eup %5473 }
 0x602   :  { %v521_v47 = vmul.f32 %v5474_v46, %v5470_v37 }
 0x604   :  { %5010 = vmatmul.mubr.msk.f32.vlgmr.msra.gmra.mrb[6].mxu1 %vm333_vm6, %v521_v47 }
 0x605   :  { %5013 = vmatpush3.msra.mxu1 %v600_v44  ;;  %5014 = vmatprep.mubr.msk.f32.mxu1 %vm5567_vm5, %v5566_v13 }
 0x606   :  { %5017 = vmatprep.subr.mxu1 %v5566_v13 }
 0x62b   :  { %v518_v49 = vpop.xlane.xlu0 %517 }
 0x62c   :  { %5475 = vrcp.f32 %v518_v49 }
 0x62f   :  { %v756_v54 = vpop.permute.xlu0 %755 }
 0x633   :  { %v754_v57 = vpop.permute.xlu0 %753 }
 0x636   :  { %v5476_v50 = vpop.eup %5475 }
 0x637   :  { %v522_v52 = vmul.f32 %v5476_v50, %v5472_v42 }
 0x639   :  { %5015 = vmatmul.mubr.msk.f32.vlgmr.msra.gmra.mrb[8].mxu1 %vm333_vm6, %v522_v52 }
 0x63a   :  { %5018 = vmatpush3.xpose.msk.msra.mxu1 %vm333_vm6, %v678_v48  ;;  %5019 = vmatprep.mubr.msk.f32.mxu1 %vm5567_vm5, %v5566_v13 }
 0x63b   :  { %5022 = vmatprep.subr.mxu1 %v5566_v13 }
 0x63d   :  { %5020 = vmatmul.mubr.msk.f32.vlgmr.msra.gmra.mrb[10].mxu1 %vm333_vm6, %v676_v56 }
 0x63e   :  { %5023 = vmatpush3.xpose.msk.msra.mxu1 %vm333_vm6, %v756_v54  ;;  %5024 = vmatprep.mubr.msk.f32.mxu1 %vm5567_vm5, %v5566_v13 }
 0x63f   :  { %5032 = vmatprep.subr.mxu1 %v5566_v13 }
 0x641   :  { %5025 = vmatmul.mubr.msk.f32.vlgmr.msra.gmra.mrb[12].mxu1 %vm333_vm6, %v754_v57 }
 0x642   :  { %5034 = vmatprep.mubr.msk.f32.mxu1 %vm5567_vm5, %v5566_v13 }
 0x6d7   :  { %v5846_v58 = vpop.f32.mrb[6].mxu1 }
 0x6d8   :  { %v5011_v59 = vpop.f32.mrb[7].mxu1 }
 0x70c   :  { %v5848_v60 = vpop.f32.mrb[8].mxu1 }
 0x70d   :  { %v5016_v61 = vpop.f32.mrb[9].mxu1 }
 0x710   :  { %v749_v63 = vpop.f32.mrb[10].mxu1 }
 0x711   :  { %v5021_v0 = vpop.f32.mrb[11].mxu1  ;;  %v831_v11 = vmul.f32 0.35355338, %v749_v63 }
 0x713   :  { %v833_v12 = vadd.f32 %v831_v11, %v5803_v20 }
 0x714   :  { %v827_v1 = vpop.f32.mrb[12].mxu1 }
 0x715   :  { %v832_v3 = vmul.f32 0.35355338, %v827_v1  ;;  %v5026_v6 = vpop.f32.mrb[13].mxu1  ;;  %v835_v14 = vsel %vm333_vm6, %v833_v12, -inf }
 0x717   :  { %v834_v7 = vadd.f32 %v832_v3, %v5807_v26 }
 0x719   :  { %v838_v8 = vsel %vm333_vm6, %v834_v7, -inf }
 0x71a   :  { %839 = vmax.xlane.f32.xlu0 %v838_v8 }
 0x730   :  { %933 = vrot.lane.b32.xlu0 %v5780_v10, %s6435_s20 }
 0x734   :  { %1171 = vrot.lane.b32.xlu0 %v5776_v9, %s5574_s22 }
 0x738   :  { %1251 = vrot.lane.b32.xlu0 %v5780_v10, %s5571_s4 }
 0x757   :  { %836 = vmax.xlane.f32.xlu0 %v835_v14 }
 0x76d   :  { %857 = vrot.lane.b32.xlu0 %v5776_v9, %s6435_s20 }
 0x771   :  { %1353 = vrot.lane.b32.xlu0 %v5776_v9, %s6433_s23 }
 0x775   :  { %1590 = vrot.lane.b32.xlu0 %v5776_v9, %s6431_s24 }
 0x779   :  { %1668 = vrot.lane.b32.xlu0 %v5780_v10, %s6431_s24 }
 0x77d   :  { %1588 = vrot.lane.b32.xlu0 %v5776_v9, %s6429_s25 }
 0x781   :  { %1666 = vrot.lane.b32.xlu0 %v5780_v10, %s6429_s25 }
 0x7a7   :  { %v840_v16 = vpop.xlane.xlu0 %839 }
 0x7a8   :  { %v842_v17 = vsub.f32 %v834_v7, %v840_v16 }
 0x7aa   :  { %v845_v18 = vmul.f32 1.442695, %v842_v17 }
 0x7ab   :  { %v934_v19 = vpop.permute.xlu0 %933 }
 0x7ac   :  { %5477 = vpow2.f32 %v845_v18  ;;  %5033 = vmatpush3.msra.mxu1 %v934_v19 }
 0x7ad   :  { %5047 = vmatprep.subr.mxu1 %v5566_v13 }
 0x7af   :  { %v1172_v23 = vpop.permute.xlu0 %1171 }
 0x7b3   :  { %v1252_v24 = vpop.permute.xlu0 %1251 }
 0x7b6   :  { %v5478_v21 = vpop.eup %5477 }
 0x7b7   :  { %v850_v22 = vsel %vm333_vm6, %v5478_v21, 0.0 }
 0x7b8   :  { %851 = vadd.xlane.f32.xlu1 %v850_v22 }
 0x7c9   :  { %1249 = vrot.lane.b32.xlu1 %v5780_v10, %s5574_s22 }
 0x7e4   :  { %v837_v25 = vpop.xlane.xlu0 %836 }
 0x7e5   :  { %v841_v27 = vsub.f32 %v833_v12, %v837_v25 }
 0x7e7   :  { %v843_v28 = vmul.f32 1.442695, %v841_v27 }
 0x7e8   :  { %v858_v29 = vpop.permute.xlu0 %857 }
 0x7e9   :  { %5479 = vpow2.f32 %v843_v28  ;;  %5028 = vmatpush3.msra.mxu0 %v858_v29 }
 0x7ea   :  { %5037 = vmatprep.subr.mxu0 %v327_v40 }
 0x7ec   :  { %v1354_v61 = vpop.permute.xlu0 %1353 }
 0x7f0   :  { %v1591_v18 = vpop.permute.xlu0 %1590 }
 0x7f3   :  { %v5480_v30 = vpop.eup %5479 }
 0x7f4   :  { %v847_v31 = vsel %vm333_vm6, %v5480_v30, 0.0 }
 0x7f5   :  { %848 = vadd.xlane.f32.xlu1 %v847_v31 }
 0x845   :  { %v852_v33 = vpop.xlane.xlu1 %851 }
 0x846   :  { %5481 = vrcp.f32 %v852_v33 }
 0x849   :  { %v1250_v36 = vpop.permute.xlu1 %1249 }
 0x850   :  { %v5482_v34 = vpop.eup %5481 }
 0x851   :  { %v856_v35 = vmul.f32 %v5482_v34, %v5478_v21 }
 0x853   :  { %5035 = vmatmul.mubr.msk.f32.vlgmr.msra.gmra.mrb[14].mxu1 %vm333_vm6, %v856_v35 }
 0x854   :  { %5048 = vmatpush3.xpose.msk.msra.mxu1 %vm333_vm6, %v1174_v32  ;;  %5049 = vmatprep.mubr.msk.f32.mxu1 %vm5567_vm5, %v5566_v13 }
 0x855   :  { %5052 = vmatprep.subr.mxu1 %v5566_v13 }
 0x857   :  { %5050 = vmatmul.mubr.msk.f32.vlgmr.msra.gmra.mrb[16].mxu1 %vm333_vm6, %v1172_v23  ;;  %v1669_v23 = vpop.permute.xlu0 %1668 }
 0x858   :  { %5053 = vmatpush3.xpose.msk.msra.mxu1 %vm333_vm6, %v1252_v24  ;;  %5054 = vmatprep.mubr.msk.f32.mxu1 %vm5567_vm5, %v5566_v13 }
 0x859   :  { %5062 = vmatprep.subr.mxu1 %v5566_v13 }
 0x85b   :  { %5055 = vmatmul.mubr.msk.f32.vlgmr.msra.gmra.mrb[18].mxu1 %vm333_vm6, %v1250_v36  ;;  %v1589_v25 = vpop.permute.xlu0 %1588 }
 0x85c   :  { %5064 = vmatprep.mubr.msk.f32.mxu1 %vm5567_vm5, %v5566_v13 }
 0x85f   :  { %v1667_v31 = vpop.permute.xlu0 %1666 }
 0x882   :  { %v849_v37 = vpop.xlane.xlu1 %848 }
 0x883   :  { %5483 = vrcp.f32 %v849_v37 }
 0x88d   :  { %v5484_v38 = vpop.eup %5483 }
 0x88e   :  { %v855_v39 = vmul.f32 %v5484_v38, %v5480_v30 }
 0x890   :  { %5030 = vmatmul.mubr.msk.f32.vlgmr.msra.gmra.mrb[2].mxu0 %vm333_vm6, %v855_v39 }
 0x891   :  { %5038 = vmatpush3.msra.mxu0 %v327_v40 }
 0x892   :  { %5042 = vmatprep.subr.mxu0 %v326_v41 }
 0x926   :  { %v1005_v42 = vpop.f32.mrb[14].mxu1 }
 0x927   :  { %v5036_v43 = vpop.f32.mrb[15].mxu1 }
 0x92a   :  { %v1245_v44 = vpop.f32.mrb[16].mxu1 }
 0x92b   :  { %v1327_v45 = vmul.f32 0.35355338, %v1245_v44  ;;  %v5051_v46 = vpop.f32.mrb[17].mxu1 }
 0x92d   :  { %v1329_v47 = vadd.f32 %v1327_v45, %v5803_v20 }
 0x92e   :  { %v1323_v48 = vpop.f32.mrb[18].mxu1 }
 0x92f   :  { %v1328_v49 = vmul.f32 0.35355338, %v1323_v48  ;;  %v5056_v50 = vpop.f32.mrb[19].mxu1  ;;  %v1331_v52 = vsel %vm333_vm6, %v1329_v47, -inf }
 0x930   :  { %1332 = vmax.xlane.f32.xlu1 %v1331_v52 }
 0x931   :  { %v1330_v54 = vadd.f32 %v1328_v49, %v5807_v26 }
 0x933   :  { %v1334_v56 = vsel %vm333_vm6, %v1330_v54, -inf }
 0x934   :  { %1335 = vmax.xlane.f32.xlu1 %v1334_v56 }
 0x963   :  { %v929_v57 = vpop.f32.mrb[2].mxu0 }
 0x964   :  { %v5031_v59 = vpop.f32.mrb[3].mxu0  ;;  %5039 = vmatprep.mubr.msk.f32.mxu0 %vm333_vm6, %v929_v57 }
 0x965   :  { %5040 = vmatmul.mubr.msk.f32.vlgmr.msra.gmra.mrb[4].mxu0 %vm333_vm6, %v1005_v42 }
 0x966   :  { %5044 = vmatprep.mubr.msk.f32.mxu0 %vm333_vm6, %v5846_v58  ;;  %5043 = vmatpush3.msra.mxu0 %v326_v41 }
 0x967   :  { %5057 = vmatprep.subr.mxu0 %v5566_v13 }
 0x96d   :  { %5045 = vmatmul.mubr.msk.f32.vlgmr.msra.gmra.mrb[4].mxu0 %vm333_vm6, %v5848_v60  ;;  %v328_v60 = vld [vmem:[%s6411_s9 + $0x10] sm:$0xff] }
 0x96e   :  { %5058 = vmatpush3.msra.mxu0 %v1354_v61  ;;  %5059 = vmatprep.mubr.msk.f32.mxu0 %vm5567_vm5, %v5566_v13  ;;  %v329_v61 = vld [vmem:[%s6411_s9 + $0x18] sm:$0xff] }
 0x96f   :  { %5067 = vmatprep.subr.mxu0 %v328_v60 }
 0x9bd   :  { %v1333_v63 = vpop.xlane.xlu1 %1332 }
 0x9be   :  { %v1337_v0 = vsub.f32 %v1329_v47, %v1333_v63 }
 0x9c0   :  { %v1339_v1 = vmul.f32 1.442695, %v1337_v0 }
 0x9c1   :  { %v1336_v3 = vpop.xlane.xlu1 %1335 }
 0x9c2   :  { %5485 = vpow2.f32 %v1339_v1  ;;  %v1338_v6 = vsub.f32 %v1330_v54, %v1336_v3 }
 0x9c4   :  { %v1341_v7 = vmul.f32 1.442695, %v1338_v6 }
 0x9c6   :  { %5487 = vpow2.f32 %v1341_v7 }
 0x9cc   :  { %v5486_v58 = vpop.eup %5485 }
 0x9cd   :  { %v1343_v8 = vsel %vm333_vm6, %v5486_v58, 0.0 }
 0x9ce   :  { %1344 = vadd.xlane.f32.xlu1 %v1343_v8 }
 0x9d0   :  { %v5488_v11 = vpop.eup %5487 }
 0x9d1   :  { %v1346_v12 = vsel %vm333_vm6, %v5488_v11, 0.0 }
 0x9d2   :  { %1347 = vadd.xlane.f32.xlu1 %v1346_v12 }
 0x9e3   :  { %1429 = vrot.lane.b32.xlu1 %v5780_v10, %s6433_s23 }
 0xa5b   :  { %v1345_v14 = vpop.xlane.xlu1 %1344 }
 0xa5c   :  { %5489 = vrcp.f32 %v1345_v14 }
 0xa5f   :  { %v1348_v16 = vpop.xlane.xlu1 %1347 }
 0xa60   :  { %5491 = vrcp.f32 %v1348_v16 }
 0xa63   :  { %v1430_v17 = vpop.permute.xlu1 %1429 }
 0xa64   :  { %5063 = vmatpush3.msra.mxu1 %v1430_v17 }
 0xa65   :  { %5072 = vmatprep.subr.mxu1 %v5566_v13 }
 0xa66   :  { %v5490_v19 = vpop.eup %5489 }
 0xa67   :  { %v1351_v21 = vmul.f32 %v5490_v19, %v5486_v58  ;;  %v4714_v58 = vld [vmem:[%s6412_s10] ss:$0 sm:$0xff] }
 0xa69   :  { %5060 = vmatmul.mubr.msk.f32.vlgmr.msra.gmra.mrb[6].mxu0 %vm333_vm6, %v1351_v21 }
 0xa6a   :  { %v5492_v22 = vpop.eup %5491  ;;  %5068 = vmatpush3.msra.mxu0 %v328_v60 }
 0xa6b   :  { %v1352_v24 = vmul.f32 %v5492_v22, %v5488_v11  ;;  %5077 = vmatprep.subr.mxu0 %v5566_v13 }
 0xa6d   :  { %5065 = vmatmul.mubr.msk.f32.vlgmr.msra.gmra.mrb[20].mxu1 %vm333_vm6, %v1352_v24 }
 0xa6e   :  { %5073 = vmatpush3.xpose.msk.msra.mxu1 %vm333_vm6, %v1591_v18  ;;  %5074 = vmatprep.mubr.msk.f32.mxu1 %vm5567_vm5, %v5566_v13 }
 0xa6f   :  { %5082 = vmatprep.subr.mxu1 %v5566_v13 }
 0xa71   :  { %5075 = vmatmul.mubr.msk.f32.vlgmr.msra.gmra.mrb[22].mxu1 %vm333_vm6, %v1589_v25 }
 0xa72   :  { %5084 = vmatprep.mubr.msk.f32.mxu1 %vm5567_vm5, %v5566_v13 }
 0xb3c   :  { %v1425_v27 = vpop.f32.mrb[6].mxu0 }
 0xb3d   :  { %v5061_v28 = vpop.f32.mrb[7].mxu0  ;;  %5069 = vmatprep.mubr.msk.f32.mxu0 %vm333_vm6, %v1425_v27 }
 0xb40   :  { %v1501_v29 = vpop.f32.mrb[20].mxu1 }
 0xb41   :  { %v5066_v30 = vpop.f32.mrb[21].mxu1  ;;  %5070 = vmatmul.mubr.msk.f32.vlgmr.msra.gmra.mrb[4].mxu0 %vm333_vm6, %v1501_v29 }
 0xb42   :  { %5078 = vmatpush3.xpose.msk.msra.mxu0 %vm333_vm6, %v1669_v23  ;;  %5079 = vmatprep.mubr.msk.f32.mxu0 %vm5567_vm5, %v5566_v13  ;;  %v2056_v30 = vld [vmem:[%s6413_s12 + $0x8] sm:$0xff] }
 0xb43   :  { %5087 = vmatprep.subr.mxu0 %v5566_v13 }
 0xb44   :  { %v1662_v32 = vpop.f32.mrb[22].mxu1 }
 0xb45   :  { %v1744_v33 = vmul.f32 0.35355338, %v1662_v32  ;;  %v5076_v34 = vpop.f32.mrb[23].mxu1  ;;  %5080 = vmatmul.mubr.msk.f32.vlgmr.msra.gmra.mrb[8].mxu0 %vm333_vm6, %v1667_v31  ;;  %v2057_v32 = vld [vmem:[%s6413_s12 + $0x10] sm:$0xff] }
 0xb46   :  { %5089 = vmatprep.mubr.msk.f32.mxu0 %vm5567_vm5, %v5566_v13 }
 0xb47   :  { %v1746_v35 = vadd.f32 %v1744_v33, %v5803_v20  ;;  %v2058_v33 = vld [vmem:[%s6413_s12 + $0x18] sm:$0xff] }
 0xb48   :  { %v5345_v34 = vpack.c.bf16 %v2058_v33, %v2057_v32 }
 0xb49   :  { %v1748_v36 = vsel %vm333_vm6, %v1746_v35, -inf }
 0xb4a   :  { %1749 = vmax.xlane.f32.xlu1 %v1748_v36 }
 0xbd7   :  { %v1750_v37 = vpop.xlane.xlu1 %1749 }
 0xbd8   :  { %v1754_v38 = vsub.f32 %v1746_v35, %v1750_v37 }
 0xbda   :  { %v1756_v39 = vmul.f32 1.442695, %v1754_v38 }
 0xbdc   :  { %5493 = vpow2.f32 %v1756_v39 }
 0xbe6   :  { %v5494_v45 = vpop.eup %5493 }
 0xbe7   :  { %v1760_v46 = vsel %vm333_vm6, %v5494_v45, 0.0 }
 0xc18   :  { %v1740_v40 = vpop.f32.mrb[8].mxu0 }
 0xc19   :  { %v1745_v41 = vmul.f32 0.35355338, %v1740_v40  ;;  %v5081_v42 = vpop.f32.mrb[9].mxu0 }
 0xc1b   :  { %v1747_v43 = vadd.f32 %v1745_v41, %v5807_v26  ;;  %v2016_v41 = vld [vmem:[%s6414_s11] sm:$0x3] }
 0xc1c   :  { %v2046_v42 = vrot.slane %v2016_v41, %v5745_v53 }
 0xc1d   :  { %v1751_v44 = vsel %vm333_vm6, %v1747_v43, -inf }
 0xc1e   :  { %1752 = vmax.xlane.f32.xlu0 %v1751_v44 }
 0xc22   :  { %1761 = vadd.xlane.f32.xlu0 %v1760_v46 }
 0xc38   :  { %1770 = vrot.lane.b32.xlu0 %v5776_v9, %s6427_s6 }
 0xcab   :  { %v1753_v47 = vpop.xlane.xlu0 %1752 }
 0xcac   :  { %v1755_v48 = vsub.f32 %v1747_v43, %v1753_v47  ;;  %v2052_v47 = vrot.slane %v2016_v41, %v5751_v55 }
 0xcae   :  { %v1758_v49 = vmul.f32 1.442695, %v1755_v48 }
 0xcaf   :  { %v1762_v50 = vpop.xlane.xlu0 %1761 }
 0xcb0   :  { %5495 = vpow2.f32 %v1758_v49 }
 0xcb1   :  { %5497 = vrcp.f32 %v1762_v50 }
 0xcb3   :  { %v1771_v52 = vpop.permute.xlu0 %1770 }
 0xcb4   :  { %5083 = vmatpush3.msra.mxu1 %v1771_v52 }
 0xcba   :  { %v5496_v54 = vpop.eup %5495 }
 0xcbb   :  { %v5498_v56 = vpop.eup %5497  ;;  %v1763_v57 = vsel %vm333_vm6, %v5496_v54, 0.0 }
 0xcbc   :  { %v1768_v59 = vmul.f32 %v5498_v56, %v5494_v45  ;;  %1764 = vadd.xlane.f32.xlu1 %v1763_v57  ;;  %v2166_v56 = vld [vmem:[%s6415_s14 + $0x8] sm:$0xff] }
 0xcbe   :  { %5085 = vmatmul.mubr.msk.f32.vlgmr.msra.gmra.mrb[24].mxu1 %vm333_vm6, %v1768_v59  ;;  %v2167_v59 = vld [vmem:[%s6415_s14 + $0x10] sm:$0xff] }
 0xccd   :  { %1846 = vrot.lane.b32.xlu1 %v5780_v10, %s6427_s6 }
 0xd49   :  { %v1765_v9 = vpop.xlane.xlu1 %1764 }
 0xd4a   :  { %5499 = vrcp.f32 %v1765_v9  ;;  %v2168_v9 = vld [vmem:[%s6415_s14 + $0x18] sm:$0xff] }
 0xd4d   :  { %v1847_v63 = vpop.permute.xlu1 %1846 }
 0xd4e   :  { %5088 = vmatpush3.msra.mxu0 %v1847_v63  ;;  %v2169_v63 = vld [vmem:[%s6415_s14 + $0x20] sm:$0xff] }
 0xd4f   :  { %5092 = vmatprep.subr.mxu0 %v329_v61 }
 0xd54   :  { %v5500_v0 = vpop.eup %5499 }
 0xd55   :  { %v1769_v1 = vmul.f32 %v5500_v0, %v5496_v54  ;;  %v2165_v54 = vld [vmem:[%s6415_s14] sm:$0xff]  ;;  %v2170_v0 = vld [vmem:[%s6415_s14 + $0x28] sm:$0xff] }
 0xd56   :  { %v5349_v57 = vpack.c.bf16 %v2166_v56, %v2165_v54 }
 0xd57   :  { %5090 = vmatmul.mubr.msk.f32.vlgmr.msra.gmra.mrb[10].mxu0 %vm333_vm6, %v1769_v1  ;;  %v5357_v1 = vpack.c.bf16 %v2170_v0, %v2169_v63 }
 0xd58   :  { %5093 = vmatpush3.msra.mxu0 %v329_v61  ;;  %v5353_v61 = vpack.c.bf16 %v2168_v9, %v2167_v59 }
 0xd59   :  { %5350 = vmatprep.subr.bf16.mxu0 %v5349_v57 }
 0xd91   :  { %v1842_v3 = vpop.f32.mrb[24].mxu1 }
 0xd92   :  { %v5086_v6 = vpop.f32.mrb[25].mxu1  ;;  %5094 = vmatprep.mubr.msk.f32.mxu0 %vm333_vm6, %v1842_v3  ;;  %v2171_v3 = vld [vmem:[%s6415_s14 + $0x30] sm:$0xff] }
 0xd93   :  { %v2172_v6 = vld [vmem:[%s6415_s14 + $0x38] sm:$0xff] }
 0xe2a   :  { %v1918_v7 = vpop.f32.mrb[10].mxu0 }
 0xe2b   :  { %v5091_v10 = vpop.f32.mrb[11].mxu0  ;;  %5095 = vmatmul.mubr.msk.f32.vlgmr.msra.gmra.mrb[4].mxu0 %vm333_vm6, %v1918_v7  ;;  %v5361_v7 = vpack.c.bf16 %v2172_v6, %v2171_v3 }
 0xe2c   :  { %5352 = vmatpush3.bf16.msra.mxu0 %v5349_v57  ;;  %v2173_v10 = vld [vmem:[%s6415_s14 + $0x40] sm:$0xff] }
 0xe2d   :  { %5354 = vmatprep.subr.bf16.mxu0 %v5353_v61 }
 0xe30   :  { %5356 = vmatpush3.bf16.msra.mxu0 %v5353_v61 }
 0xe31   :  { %5358 = vmatprep.subr.bf16.mxu0 %v5357_v1 }
 0xe34   :  { %5360 = vmatpush3.bf16.msra.mxu0 %v5357_v1 }
 0xe35   :  { %5362 = vmatprep.subr.bf16.mxu0 %v5361_v7 }
 0xe38   :  { %5364 = vmatpush3.bf16.msra.mxu0 %v5361_v7 }
 0xefe   :  { %v5096_v8 = vpop.f32.mrb[4].mxu0 }
 0xeff   :  { %v2013_v11 = vadd.f32 %v5096_v8, %v4714_v58  ;;  %v1994_v12 = vpop.f32.mrb[5].mxu0  ;;  %v2175_v8 = vld [vmem:[%s6415_s14 + $0x50] sm:$0xff] }
 0xf00   :  { %v2012_v60 = vadd.f32 %v4714_v58, %v1994_v12  ;;  %v2174_v58 = vld [vmem:[%s6415_s14 + $0x48] sm:$0xff]  ;;  %v2176_v12 = vld [vmem:[%s6415_s14 + $0x58] sm:$0xff] }
 0xf01   :  { %v2015_v14 = vadd.f32 %v2013_v11, %v5765_v5  ;;  %v5365_v11 = vpack.c.bf16 %v2174_v58, %v2173_v10  ;;  %v4720_v10 = vld [vmem:[%s6407_s7 + $0x28] sm:$0xff] }
 0xf02   :  { %v2014_v16 = vadd.f32 %v2012_v60, %v5758_v2  ;;  %v2055_v2 = vld [vmem:[%s6413_s12] sm:$0xff]  ;;  %v5369_v60 = vpack.c.bf16 %v2176_v12, %v2175_v8  ;;  %v4721_v8 = vld [vmem:[%s6407_s7 + $0x30] sm:$0xff] }
 0xf03   :  { %v2020_v17 = vsel %vm182_vm4, %v2015_v14, 0.0  ;;  %v5341_v31 = vpack.c.bf16 %v2056_v30, %v2055_v2  ;;  %5366 = vmatprep.subr.bf16.mxu0 %v5365_v11 }
 0xf04   :  { %2021 = vadd.xlane.f32.xlu0 %v2020_v17  ;;  %v2017_v18 = vsel %vm182_vm4, %v2014_v16, 0.0  ;;  %5368 = vmatpush3.bf16.msra.mxu0 %v5365_v11  ;;  %v4722_v11 = vld [vmem:[%s6407_s7 + $0x38] sm:$0xff] }
 0xf05   :  { %2018 = vadd.xlane.f32.xlu1 %v2017_v18  ;;  %5342 = vmatprep.subr.bf16.mxu1 %v5341_v31  ;;  %v2179_v18 = vld [vmem:[%s6415_s14 + $0x70] sm:$0xff]  ;;  %v5385_v12 = vpack.c.bf16 %v4722_v11, %v4721_v8 }
 0xf06   :  { %5344 = vmatpush3.bf16.msra.mxu1 %v5341_v31  ;;  %5370 = vmatprep.subr.bf16.mxu0 %v5369_v60 }
 0xf07   :  { %5346 = vmatprep.subr.bf16.mxu1 %v5345_v34 }
 0xf08   :  { %5372 = vmatpush3.bf16.msra.mxu0 %v5369_v60 }
 0xf0a   :  { %5348 = vmatpush3.bf16.msra.mxu1 %v5345_v34 }
 0xf91   :  { %v2022_v19 = vpop.xlane.xlu0 %2021 }
 0xf92   :  { %v2024_v21 = vmul.f32 0.03125, %v2022_v19  ;;  %v2019_v22 = vpop.xlane.xlu1 %2018  ;;  %v2180_v19 = vld [vmem:[%s6415_s14 + $0x78] sm:$0xff] }
 0xf93   :  { %v2023_v23 = vmul.f32 0.03125, %v2019_v22  ;;  %v4715_v22 = vld [vmem:[%s6416_s13] ss:$0 sm:$0xff] }
 0xf94   :  { %v2026_v24 = vsub.f32 %v2015_v14, %v2024_v21  ;;  %v2177_v14 = vld [vmem:[%s6415_s14 + $0x60] sm:$0xff]  ;;  %v5377_v21 = vpack.c.bf16 %v2180_v19, %v2179_v18 }
 0xf95   :  { %v2025_v25 = vsub.f32 %v2014_v16, %v2023_v23  ;;  %v2178_v16 = vld [vmem:[%s6415_s14 + $0x68] sm:$0xff] }
 0xf96   :  { %v2028_v27 = vmul.f32 %v2026_v24, %v2026_v24  ;;  %v5373_v17 = vpack.c.bf16 %v2178_v16, %v2177_v14 }
 0xf97   :  { %v2027_v28 = vmul.f32 %v2025_v25, %v2025_v25 }
 0xf98   :  { %v2032_v29 = vsel %vm182_vm4, %v2028_v27, 0.0  ;;  %5374 = vmatprep.subr.bf16.mxu0 %v5373_v17 }
 0xf99   :  { %2033 = vadd.xlane.f32.xlu1 %v2032_v29  ;;  %v2029_v5 = vsel %vm182_vm4, %v2027_v28, 0.0  ;;  %5376 = vmatpush3.bf16.msra.mxu0 %v5373_v17 }
 0xf9a   :  { %2030 = vadd.xlane.f32.xlu0 %v2029_v5  ;;  %5378 = vmatprep.subr.bf16.mxu0 %v5377_v21 }
 0xf9d   :  { %5380 = vmatpush3.bf16.msra.mxu0 %v5377_v21  ;;  %v2265_v21 = vld [vmem:[%s6418_s16] sm:$0x3] }
 0xf9e   :  { %5184 = vmatprep.subr.mxu0 %v5566_v13 }
0x1026   :  { %v2034_v35 = vpop.xlane.xlu1 %2033 }
0x1027   :  { %v2036_v36 = vmul.f32 0.03125, %v2034_v35  ;;  %v2031_v37 = vpop.xlane.xlu0 %2030 }
0x1028   :  { %v2035_v38 = vmul.f32 0.03125, %v2031_v37 }
0x1029   :  { %v2038_v39 = vadd.f32 1e-12, %v2036_v36 }
0x102a   :  { %v2037_v40 = vadd.f32 1e-12, %v2035_v38 }
0x102b   :  { %5501 = vrsqrt.f32 %v2038_v39 }
0x102c   :  { %5503 = vrsqrt.f32 %v2037_v40 }
0x1035   :  { %v5502_v43 = vpop.eup %5501 }
0x1036   :  { %v5504_v44 = vpop.eup %5503  ;;  %v2042_v45 = vmul.f32 %v5502_v43, %v2026_v24 }
0x1037   :  { %v2041_v46 = vmul.f32 %v5504_v44, %v2025_v25  ;;  %v4718_v44 = vld [vmem:[%s6417_s15] ss:$0 sm:$0xff] }
0x1038   :  { %v2048_v48 = vmul.f32 %v2046_v42, %v2042_v45 }
0x1039   :  { %v2047_v49 = vmul.f32 %v2046_v42, %v2041_v46 }
0x103a   :  { %v5982_v52 = vadd.f32 %v2052_v47, %v2048_v48 }
0x103b   :  { %v5980_v50 = vadd.f32 %v2052_v47, %v2047_v49 }
0x103d   :  { %5105 = vmatprep.mubr.msk.f32.mxu1 %vm182_vm4, %v5980_v50 }
0x103e   :  { %5106 = vmatmul.mubr.msk.f32.vlgmr.msra.gmra.mrb[26].mxu1 %vm182_vm4, %v5982_v52 }
0x1111   :  { %v5107_v23 = vpop.f32.mrb[26].mxu1 }
0x1112   :  { %v2144_v24 = vadd.f32 %v5107_v23, %v4715_v22  ;;  %v2138_v25 = vpop.f32.mrb[27].mxu1 }
0x1113   :  { %v2139_v27 = vadd.f32 %v4715_v22, %v2138_v25  ;;  %v2295_v22 = vrot.slane %v2265_v21, %v5745_v53 }
0x1114   :  { %v2148_v28 = vmul.f32 %v2144_v24, %v2144_v24 }
0x1115   :  { %v2147_v29 = vmul.f32 %v2139_v27, %v2139_v27 }
0x1116   :  { %v2150_v5 = vmul.f32 %v2148_v28, %v2144_v24 }
0x1117   :  { %v2149_v2 = vmul.f32 %v2147_v29, %v2139_v27 }
0x1118   :  { %v2152_v30 = vmul.f32 0.044715, %v2150_v5 }
0x1119   :  { %v2151_v31 = vmul.f32 0.044715, %v2149_v2 }
0x111a   :  { %v2154_v32 = vadd.f32 %v2152_v30, %v2144_v24 }
0x111b   :  { %v2153_v33 = vadd.f32 %v2151_v31, %v2139_v27 }
0x111c   :  { %v2156_v34 = vmul.f32 0.7978846, %v2154_v32 }
0x111d   :  { %v2155_v35 = vmul.f32 0.7978846, %v2153_v33  ;;  %v4724_v33 = vld [vmem:[%s6409_s8 + $0x1] ss:$0 sm:$0xff]  ;;  %s6445_s8 = smov 56  }
0x111e   :  { %5505 = vtanh.f32 %v2156_v34 }
0x111f   :  { %5507 = vtanh.f32 %v2155_v35 }
0x1128   :  { %v5506_v36 = vpop.eup %5505 }
0x1129   :  { %v5508_v37 = vpop.eup %5507  ;;  %v2160_v38 = vadd.f32 1.0, %v5506_v36 }
0x112a   :  { %v2159_v39 = vadd.f32 1.0, %v5508_v37 }
0x112b   :  { %v2162_v40 = vmul.f32 0.5, %v2160_v38 }
0x112c   :  { %v2161_v41 = vmul.f32 0.5, %v2159_v39 }
0x112d   :  { %v2164_v43 = vmul.f32 %v2162_v40, %v2144_v24 }
0x112e   :  { %v2163_v42 = vmul.f32 %v2161_v41, %v2139_v27  ;;  %v2301_v27 = vrot.slane %v2265_v21, %v5751_v55 }
0x1130   :  { %5140 = vmatprep.mubr.f32.mxu0 %v2163_v42 }
0x1131   :  { %5141 = vmatmul.mubr.f32.vlgmr.msra.gmra.mrb[12].mxu0 %v2164_v43 }
0x1132   :  { %5186 = vmatprep.mubr.msk.f32.mxu0 %vm5567_vm5, %v5566_v13 }
0x1204   :  { %v5142_v45 = vpop.f32.mrb[12].mxu0 }
0x1205   :  { %v2260_v46 = vadd.f32 %v5142_v45, %v4718_v44  ;;  %v2254_v47 = vpop.f32.mrb[13].mxu0 }
0x1206   :  { %v2255_v48 = vadd.f32 %v4718_v44, %v2254_v47 }
0x1207   :  { %v2264_v49 = vadd.f32 %v2260_v46, %v5982_v52 }
0x1208   :  { %v2263_v54 = vadd.f32 %v2255_v48, %v5980_v50  ;;  %v4719_v50 = vld [vmem:[%s6407_s7 + $0x20] sm:$0xff] }
0x1209   :  { %v2269_v56 = vsel %vm182_vm4, %v2264_v49, 0.0  ;;  %v5381_v58 = vpack.c.bf16 %v4720_v10, %v4719_v50 }
0x120a   :  { %2270 = vadd.xlane.f32.xlu1 %v2269_v56  ;;  %v2266_v57 = vsel %vm182_vm4, %v2263_v54, 0.0 }
0x120b   :  { %2267 = vadd.xlane.f32.xlu0 %v2266_v57  ;;  %5382 = vmatprep.subr.bf16.mxu1 %v5381_v58 }
0x120c   :  { %5384 = vmatpush3.bf16.msra.mxu1 %v5381_v58 }
0x120d   :  { %5386 = vmatprep.subr.bf16.mxu1 %v5385_v12 }
0x1210   :  { %5388 = vmatpush3.bf16.msra.mxu1 %v5385_v12 }
0x1211   :  { %5154 = vmatprep.subr.mxu1 %v5566_v13 }
0x1297   :  { %v2271_v59 = vpop.xlane.xlu1 %2270 }
0x1298   :  { %v2273_v9 = vmul.f32 0.03125, %v2271_v59  ;;  %v2268_v61 = vpop.xlane.xlu0 %2267 }
0x1299   :  { %v2272_v63 = vmul.f32 0.03125, %v2268_v61 }
0x129a   :  { %v2275_v0 = vsub.f32 %v2264_v49, %v2273_v9 }
0x129b   :  { %v2274_v1 = vsub.f32 %v2263_v54, %v2272_v63 }
0x129c   :  { %v2277_v3 = vmul.f32 %v2275_v0, %v2275_v0 }
0x129d   :  { %v2276_v6 = vmul.f32 %v2274_v1, %v2274_v1 }
0x129e   :  { %v2281_v7 = vsel %vm182_vm4, %v2277_v3, 0.0 }
0x129f   :  { %2282 = vadd.xlane.f32.xlu1 %v2281_v7  ;;  %v2278_v52 = vsel %vm182_vm4, %v2276_v6, 0.0 }
0x12a0   :  { %2279 = vadd.xlane.f32.xlu0 %v2278_v52 }
0x132c   :  { %v2283_v60 = vpop.xlane.xlu1 %2282 }
0x132d   :  { %v2285_v14 = vmul.f32 0.03125, %v2283_v60  ;;  %v2280_v16 = vpop.xlane.xlu0 %2279 }
0x132e   :  { %v2284_v17 = vmul.f32 0.03125, %v2280_v16 }
0x132f   :  { %v2287_v18 = vadd.f32 1e-12, %v2285_v14 }
0x1330   :  { %v2286_v19 = vadd.f32 1e-12, %v2284_v17 }
0x1331   :  { %5509 = vrsqrt.f32 %v2287_v18 }
0x1332   :  { %5511 = vrsqrt.f32 %v2286_v19 }
0x133b   :  { %v5510_v23 = vpop.eup %5509 }
0x133c   :  { %v5512_v24 = vpop.eup %5511  ;;  %v2291_v25 = vmul.f32 %v5510_v23, %v2275_v0 }
0x133d   :  { %v2290_v28 = vmul.f32 %v5512_v24, %v2274_v1 }
0x133e   :  { %v2297_v29 = vmul.f32 %v2295_v22, %v2291_v25 }
0x133f   :  { %v2296_v5 = vmul.f32 %v2295_v22, %v2290_v28 }
0x1340   :  { %v2303_v2 = vadd.f32 %v2301_v27, %v2297_v29 }
0x1341   :  { %v2302_v30 = vadd.f32 %v2301_v27, %v2296_v5 }
0x1342   :  { %v6073_v32 = vmul.f32 %v2303_v2, %v5762_v4 }
0x1343   :  { %v6070_v31 = vmul.f32 %v2302_v30, %v5755_v62 }
0x1345   :  { %5151 = vmatprep.mubr.msk.f32.mxu1 %vm182_vm4, %v6070_v31 }
0x1346   :  { %5152 = vmatmul.mubr.msk.f32.vlgmr.msra.gmra.mrb[28].mxu1 %vm182_vm4, %v6073_v32 }
0x1347   :  { %5156 = vmatprep.mubr.msk.f32.mxu1 %vm5567_vm5, %v5566_v13 }
0x1419   :  { %v5153_v34 = vpop.f32.mrb[28].mxu1 }
0x141a   :  { %v6084_v35 = vadd.f32 %v5153_v34, %v4724_v33  ;;  %v2391_v36 = vpop.f32.mrb[29].mxu1 }
0x141b   :  { %v6086_v37 = vadd.f32 %v4724_v33, %v2391_v36 }
0x141c   :  { %2483 = vrot.lane.b32.xlu1 %v6084_v35, %s5568_s26 }
0x141d   :  { %2406 = vrot.lane.b32.xlu0 %v6086_v37, %s5568_s26  ;;  %s6446_s26 = smov 48  }
0x148e   :  { %v2484_v39 = vpop.permute.xlu1 %2483 }
0x148f   :  { %v2407_v38 = vpop.permute.xlu0 %2406 }
0x1490   :  { %5155 = vmatpush3.xpose.msk.msra.mxu1 %vm333_vm6, %v2407_v38 }
0x1491   :  { %5159 = vmatprep.subr.mxu1 %v5566_v13 }
0x1493   :  { %5157 = vmatmul.mubr.msk.f32.vlgmr.msra.gmra.mrb[30].mxu1 %vm333_vm6, %v6086_v37 }
0x1494   :  { %5160 = vmatpush3.xpose.msk.msra.mxu1 %vm333_vm6, %v2484_v39  ;;  %5161 = vmatprep.mubr.msk.f32.mxu1 %vm5567_vm5, %v5566_v13 }
0x1495   :  { %5164 = vmatprep.subr.mxu1 %v5566_v13 }
0x1497   :  { %5162 = vmatmul.mubr.msk.f32.vlgmr.msra.gmra.mrb[32].mxu1 %vm333_vm6, %v6084_v35 }
0x1498   :  { %5166 = vmatprep.mubr.msk.f32.mxu1 %vm5567_vm5, %v5566_v13 }
0x1566   :  { %v2478_v40 = vpop.f32.mrb[30].mxu1 }
0x1567   :  { %v2559_v41 = vmul.f32 0.35355338, %v2478_v40  ;;  %v5158_v42 = vpop.f32.mrb[31].mxu1 }
0x1569   :  { %v2561_v43 = vadd.f32 %v2559_v41, %v5803_v20 }
0x156a   :  { %v2555_v44 = vpop.f32.mrb[32].mxu1 }
0x156b   :  { %v2560_v45 = vmul.f32 0.35355338, %v2555_v44  ;;  %v5163_v46 = vpop.f32.mrb[33].mxu1  ;;  %v2563_v47 = vsel %vm333_vm6, %v2561_v43, -inf }
0x156c   :  { %2564 = vmax.xlane.f32.xlu1 %v2563_v47 }
0x156d   :  { %v2562_v48 = vadd.f32 %v2560_v45, %v5807_v26 }
0x156f   :  { %v2566_v49 = vsel %vm333_vm6, %v2562_v48, -inf }
0x1570   :  { %2567 = vmax.xlane.f32.xlu0 %v2566_v49 }
0x157d   :  { %2661 = vrot.lane.b32.xlu1 %v6084_v35, %s5570_s21 }
0x1581   :  { %2739 = vrot.lane.b32.xlu1 %v6086_v37, %s5572_s5 }
0x15f9   :  { %v2565_v54 = vpop.xlane.xlu1 %2564 }
0x15fa   :  { %v2569_v56 = vsub.f32 %v2561_v43, %v2565_v54 }
0x15fc   :  { %v2571_v57 = vmul.f32 1.442695, %v2569_v56 }
0x15fd   :  { %v2568_v59 = vpop.xlane.xlu0 %2567  ;;  %v2662_v6 = vpop.permute.xlu1 %2661 }
0x15fe   :  { %5513 = vpow2.f32 %v2571_v57  ;;  %v2570_v9 = vsub.f32 %v2562_v48, %v2568_v59 }
0x1600   :  { %v2573_v61 = vmul.f32 1.442695, %v2570_v9 }
0x1601   :  { %v2740_v7 = vpop.permute.xlu1 %2739 }
0x1602   :  { %5515 = vpow2.f32 %v2573_v61 }
0x1608   :  { %v5514_v63 = vpop.eup %5513 }
0x1609   :  { %v2575_v0 = vsel %vm333_vm6, %v5514_v63, 0.0 }
0x160a   :  { %2576 = vadd.xlane.f32.xlu0 %v2575_v0 }
0x160c   :  { %v5516_v1 = vpop.eup %5515 }
0x160d   :  { %v2578_v3 = vsel %vm333_vm6, %v5516_v1, 0.0 }
0x160e   :  { %2579 = vadd.xlane.f32.xlu1 %v2578_v3 }
0x161f   :  { %2817 = vrot.lane.b32.xlu1 %v6084_v35, %s5572_s5 }
0x1620   :  { %2585 = vrot.lane.b32.xlu0 %v6086_v37, %s5570_s21  ;;  %s6448_s21 = smov 104  }
0x1624   :  { %2737 = vrot.lane.b32.xlu0 %v6086_v37, %s5569_s30 }
0x1628   :  { %2815 = vrot.lane.b32.xlu0 %v6084_v35, %s5569_s30  ;;  %s6447_s30 = smov 72  }
0x1697   :  { %v2577_v52 = vpop.xlane.xlu0 %2576 }
0x1698   :  { %5517 = vrcp.f32 %v2577_v52 }
0x169b   :  { %v2580_v50 = vpop.xlane.xlu1 %2579  ;;  %v2586_v10 = vpop.permute.xlu0 %2585 }
0x169c   :  { %5519 = vrcp.f32 %v2580_v50  ;;  %5165 = vmatpush3.msra.mxu1 %v2586_v10 }
0x169d   :  { %5169 = vmatprep.subr.mxu1 %v5566_v13 }
0x169f   :  { %v2738_v60 = vpop.permute.xlu0 %2737  ;;  %v2818_v14 = vpop.permute.xlu1 %2817 }
0x16a2   :  { %v5518_v58 = vpop.eup %5517 }
0x16a3   :  { %v2583_v8 = vmul.f32 %v5518_v58, %v5514_v63  ;;  %v2816_v16 = vpop.permute.xlu0 %2815 }
0x16a5   :  { %5167 = vmatmul.mubr.msk.f32.vlgmr.msra.gmra.mrb[34].mxu1 %vm333_vm6, %v2583_v8 }
0x16a6   :  { %v5520_v11 = vpop.eup %5519  ;;  %5170 = vmatpush3.msra.mxu1 %v2662_v6  ;;  %5171 = vmatprep.mubr.msk.f32.mxu1 %vm5567_vm5, %v5566_v13 }
0x16a7   :  { %v2584_v12 = vmul.f32 %v5520_v11, %v5516_v1  ;;  %5174 = vmatprep.subr.mxu1 %v5566_v13 }
0x16a9   :  { %5172 = vmatmul.mubr.msk.f32.vlgmr.msra.gmra.mrb[36].mxu1 %vm333_vm6, %v2584_v12 }
0x16aa   :  { %5176 = vmatprep.mubr.msk.f32.mxu1 %vm5567_vm5, %v5566_v13 }
0x16ad   :  { %5175 = vmatpush3.xpose.msk.msra.mxu1 %vm333_vm6, %v2740_v7 }
0x16ae   :  { %5179 = vmatprep.subr.mxu1 %v5566_v13 }
0x16b0   :  { %5177 = vmatmul.mubr.msk.f32.vlgmr.msra.gmra.mrb[38].mxu1 %vm333_vm6, %v2738_v60  ;;  %v4728_v60 = vld [vmem:[%s6411_s9 + $0x28] sm:$0xff] }
0x16b1   :  { %5180 = vmatpush3.xpose.msk.msra.mxu1 %vm333_vm6, %v2818_v14  ;;  %5181 = vmatprep.mubr.msk.f32.mxu1 %vm5567_vm5, %v5566_v13  ;;  %v4727_v14 = vld [vmem:[%s6411_s9 + $0x20] sm:$0xff] }
0x16b2   :  { %5189 = vmatprep.subr.mxu1 %v5566_v13 }
0x16b4   :  { %5182 = vmatmul.mubr.msk.f32.vlgmr.msra.gmra.mrb[40].mxu1 %vm333_vm6, %v2816_v16 }
0x16b5   :  { %5191 = vmatprep.mubr.msk.f32.mxu1 %vm5567_vm5, %v5566_v13 }
0x1778   :  { %v6140_v17 = vpop.f32.mrb[34].mxu1 }
0x1779   :  { %v5168_v18 = vpop.f32.mrb[35].mxu1 }
0x177c   :  { %v6142_v19 = vpop.f32.mrb[36].mxu1 }
0x177d   :  { %v5173_v21 = vpop.f32.mrb[37].mxu1 }
0x1783   :  { %v2811_v22 = vpop.f32.mrb[38].mxu1 }
0x1784   :  { %v5178_v23 = vpop.f32.mrb[39].mxu1  ;;  %v2893_v36 = vmul.f32 0.35355338, %v2811_v22 }
0x1786   :  { %v2895_v38 = vadd.f32 %v2893_v36, %v5803_v20 }
0x1787   :  { %v2889_v24 = vpop.f32.mrb[40].mxu1 }
0x1788   :  { %v2894_v25 = vmul.f32 0.35355338, %v2889_v24  ;;  %v5183_v27 = vpop.f32.mrb[41].mxu1  ;;  %v2897_v39 = vsel %vm333_vm6, %v2895_v38, -inf }
0x178a   :  { %v2896_v28 = vadd.f32 %v2894_v25, %v5807_v26 }
0x178c   :  { %v2900_v29 = vsel %vm333_vm6, %v2896_v28, -inf }
0x178d   :  { %2901 = vmax.xlane.f32.xlu1 %v2900_v29 }
0x179e   :  { %3235 = vrot.lane.b32.xlu1 %v6086_v37, %s5571_s4 }
0x17a2   :  { %3233 = vrot.lane.b32.xlu1 %v6086_v37, %s5574_s22 }
0x17a6   :  { %3311 = vrot.lane.b32.xlu1 %v6084_v35, %s5574_s22 }
0x181a   :  { %v2902_v5 = vpop.xlane.xlu1 %2901 }
0x181b   :  { %v2904_v2 = vsub.f32 %v2896_v28, %v2902_v5 }
0x181d   :  { %v2907_v30 = vmul.f32 1.442695, %v2904_v2 }
0x181e   :  { %v3236_v42 = vpop.permute.xlu1 %3235 }
0x181f   :  { %5521 = vpow2.f32 %v2907_v30  ;;  %v4729_v30 = vld [vmem:[%s6411_s9 + $0x30] sm:$0xff] }
0x1822   :  { %v3234_v45 = vpop.permute.xlu1 %3233 }
0x1826   :  { %v3312_v47 = vpop.permute.xlu1 %3311 }
0x1829   :  { %v5522_v33 = vpop.eup %5521 }
0x182a   :  { %v2912_v34 = vsel %vm333_vm6, %v5522_v33, 0.0 }
0x182b   :  { %2913 = vadd.xlane.f32.xlu0 %v2912_v34 }
0x1841   :  { %2995 = vrot.lane.b32.xlu0 %v6084_v35, %s6445_s8 }
0x1845   :  { %3313 = vrot.lane.b32.xlu0 %v6084_v35, %s5571_s4 }
0x1864   :  { %2898 = vmax.xlane.f32.xlu0 %v2897_v39 }
0x187a   :  { %2919 = vrot.lane.b32.xlu0 %v6086_v37, %s6445_s8 }
0x187e   :  { %3415 = vrot.lane.b32.xlu0 %v6086_v37, %s6446_s26 }
0x1882   :  { %3652 = vrot.lane.b32.xlu0 %v6086_v37, %s6447_s30 }
0x1886   :  { %3730 = vrot.lane.b32.xlu0 %v6084_v35, %s6447_s30 }
0x188a   :  { %3650 = vrot.lane.b32.xlu0 %v6086_v37, %s6448_s21 }
0x188e   :  { %3728 = vrot.lane.b32.xlu0 %v6084_v35, %s6448_s21 }
0x18b8   :  { %v2914_v40 = vpop.xlane.xlu0 %2913 }
0x18b9   :  { %5523 = vrcp.f32 %v2914_v40 }
0x18bc   :  { %v2996_v41 = vpop.permute.xlu0 %2995 }
0x18bd   :  { %5190 = vmatpush3.msra.mxu1 %v2996_v41 }
0x18be   :  { %5204 = vmatprep.subr.mxu1 %v5566_v13 }
0x18c0   :  { %v3314_v46 = vpop.permute.xlu0 %3313 }
0x18c3   :  { %v5524_v43 = vpop.eup %5523 }
0x18c4   :  { %v2918_v44 = vmul.f32 %v5524_v43, %v5522_v33 }
0x18c6   :  { %5192 = vmatmul.mubr.msk.f32.vlgmr.msra.gmra.mrb[42].mxu1 %vm333_vm6, %v2918_v44 }
0x18c7   :  { %5205 = vmatpush3.xpose.msk.msra.mxu1 %vm333_vm6, %v3236_v42  ;;  %5206 = vmatprep.mubr.msk.f32.mxu1 %vm5567_vm5, %v5566_v13 }
0x18c8   :  { %5209 = vmatprep.subr.mxu1 %v5566_v13 }
0x18ca   :  { %5207 = vmatmul.mubr.msk.f32.vlgmr.msra.gmra.mrb[44].mxu1 %vm333_vm6, %v3234_v45 }
0x18cb   :  { %5210 = vmatpush3.xpose.msk.msra.mxu1 %vm333_vm6, %v3314_v46  ;;  %5211 = vmatprep.mubr.msk.f32.mxu1 %vm5567_vm5, %v5566_v13 }
0x18cc   :  { %5219 = vmatprep.subr.mxu1 %v5566_v13 }
0x18ce   :  { %5212 = vmatmul.mubr.msk.f32.vlgmr.msra.gmra.mrb[46].mxu1 %vm333_vm6, %v3312_v47 }
0x18cf   :  { %5221 = vmatprep.mubr.msk.f32.mxu1 %vm5567_vm5, %v5566_v13 }
0x18f1   :  { %v2899_v48 = vpop.xlane.xlu0 %2898 }
0x18f2   :  { %v2903_v49 = vsub.f32 %v2895_v38, %v2899_v48 }
0x18f4   :  { %v2905_v54 = vmul.f32 1.442695, %v2903_v49 }
0x18f5   :  { %v2920_v56 = vpop.permute.xlu0 %2919 }
0x18f6   :  { %5525 = vpow2.f32 %v2905_v54  ;;  %5185 = vmatpush3.msra.mxu0 %v2920_v56 }
0x18f7   :  { %5194 = vmatprep.subr.mxu0 %v4728_v60 }
0x18f9   :  { %v3416_v33 = vpop.permute.xlu0 %3415 }
0x18fd   :  { %v3653_v38 = vpop.permute.xlu0 %3652 }
0x1900   :  { %v5526_v57 = vpop.eup %5525 }
0x1901   :  { %v2909_v59 = vsel %vm333_vm6, %v5526_v57, 0.0 }
0x1902   :  { %2910 = vadd.xlane.f32.xlu1 %v2909_v59 }
0x198f   :  { %v2911_v9 = vpop.xlane.xlu1 %2910 }
0x1990   :  { %5527 = vrcp.f32 %v2911_v9 }
0x1999   :  { %v3067_v61 = vpop.f32.mrb[42].mxu1 }
0x199a   :  { %v5528_v63 = vpop.eup %5527  ;;  %v5193_v0 = vpop.f32.mrb[43].mxu1 }
0x199b   :  { %v2917_v1 = vmul.f32 %v5528_v63, %v5526_v57 }
0x199d   :  { %5187 = vmatmul.mubr.msk.f32.vlgmr.msra.gmra.mrb[14].mxu0 %vm333_vm6, %v2917_v1  ;;  %v3307_v3 = vpop.f32.mrb[44].mxu1 }
0x199e   :  { %v3389_v6 = vmul.f32 0.35355338, %v3307_v3  ;;  %v5208_v7 = vpop.f32.mrb[45].mxu1  ;;  %5195 = vmatpush3.msra.mxu0 %v4728_v60 }
0x199f   :  { %5199 = vmatprep.subr.mxu0 %v4727_v14 }
0x19a0   :  { %v3391_v52 = vadd.f32 %v3389_v6, %v5803_v20 }
0x19a1   :  { %v3385_v50 = vpop.f32.mrb[46].mxu1 }
0x19a2   :  { %v3390_v10 = vmul.f32 0.35355338, %v3385_v50  ;;  %v5213_v58 = vpop.f32.mrb[47].mxu1  ;;  %v3393_v8 = vsel %vm333_vm6, %v3391_v52, -inf }
0x19a3   :  { %3394 = vmax.xlane.f32.xlu1 %v3393_v8 }
0x19a4   :  { %v3392_v11 = vadd.f32 %v3390_v10, %v5807_v26 }
0x19a6   :  { %v3396_v12 = vsel %vm333_vm6, %v3392_v11, -inf }
0x19a7   :  { %3397 = vmax.xlane.f32.xlu1 %v3396_v12 }
0x1a30   :  { %v3395_v16 = vpop.xlane.xlu1 %3394 }
0x1a31   :  { %v3399_v18 = vsub.f32 %v3391_v52, %v3395_v16  ;;  %v4730_v16 = vld [vmem:[%s6411_s9 + $0x38] sm:$0xff] }
0x1a33   :  { %v3401_v21 = vmul.f32 1.442695, %v3399_v18 }
0x1a34   :  { %v3398_v22 = vpop.xlane.xlu1 %3397 }
0x1a35   :  { %5529 = vpow2.f32 %v3401_v21  ;;  %v3400_v23 = vsub.f32 %v3392_v11, %v3398_v22 }
0x1a37   :  { %v3403_v24 = vmul.f32 1.442695, %v3400_v23 }
0x1a39   :  { %5531 = vpow2.f32 %v3403_v24 }
0x1a3f   :  { %v5530_v25 = vpop.eup %5529 }
0x1a40   :  { %v3405_v27 = vsel %vm333_vm6, %v5530_v25, 0.0 }
0x1a41   :  { %3406 = vadd.xlane.f32.xlu1 %v3405_v27  ;;  %v4764_v27 = vld [vmem:[%s6412_s10 + $0x1] ss:$0 sm:$0xff] }
0x1a43   :  { %v5532_v28 = vpop.eup %5531 }
0x1a44   :  { %v3408_v29 = vsel %vm333_vm6, %v5532_v28, 0.0 }
0x1a45   :  { %3409 = vadd.xlane.f32.xlu1 %v3408_v29 }
0x1a56   :  { %3491 = vrot.lane.b32.xlu1 %v6084_v35, %s6446_s26 }
0x1a70   :  { %v2991_v5 = vpop.f32.mrb[14].mxu0 }
0x1a71   :  { %v5188_v2 = vpop.f32.mrb[15].mxu0  ;;  %5196 = vmatprep.mubr.msk.f32.mxu0 %vm333_vm6, %v2991_v5 }
0x1a72   :  { %5197 = vmatmul.mubr.msk.f32.vlgmr.msra.gmra.mrb[16].mxu0 %vm333_vm6, %v3067_v61 }
0x1a73   :  { %5201 = vmatprep.mubr.msk.f32.mxu0 %vm333_vm6, %v6140_v17  ;;  %5200 = vmatpush3.msra.mxu0 %v4727_v14 }
0x1a74   :  { %5214 = vmatprep.subr.mxu0 %v5566_v13 }
0x1a7a   :  { %5202 = vmatmul.mubr.msk.f32.vlgmr.msra.gmra.mrb[16].mxu0 %vm333_vm6, %v6142_v19  ;;  %v3731_v19 = vpop.permute.xlu0 %3730 }
0x1a7b   :  { %5215 = vmatpush3.msra.mxu0 %v3416_v33  ;;  %5216 = vmatprep.mubr.msk.f32.mxu0 %vm5567_vm5, %v5566_v13 }
0x1a7c   :  { %5224 = vmatprep.subr.mxu0 %v4729_v30 }
0x1a7e   :  { %v3651_v43 = vpop.permute.xlu0 %3650 }
0x1a82   :  { %v3729_v48 = vpop.permute.xlu0 %3728 }
0x1ace   :  { %v3407_v34 = vpop.xlane.xlu1 %3406 }
0x1acf   :  { %5533 = vrcp.f32 %v3407_v34 }
0x1ad2   :  { %v3410_v36 = vpop.xlane.xlu1 %3409 }
0x1ad3   :  { %5535 = vrcp.f32 %v3410_v36 }
0x1ad6   :  { %v3492_v17 = vpop.permute.xlu1 %3491 }
0x1ad7   :  { %5220 = vmatpush3.msra.mxu1 %v3492_v17 }
0x1ad8   :  { %5229 = vmatprep.subr.mxu1 %v5566_v13 }
0x1ad9   :  { %v5534_v39 = vpop.eup %5533 }
0x1ada   :  { %v3413_v40 = vmul.f32 %v5534_v39, %v5530_v25 }
0x1adc   :  { %5217 = vmatmul.mubr.msk.f32.vlgmr.msra.gmra.mrb[18].mxu0 %vm333_vm6, %v3413_v40 }
0x1add   :  { %v5536_v41 = vpop.eup %5535  ;;  %5225 = vmatpush3.msra.mxu0 %v4729_v30 }
0x1ade   :  { %v3414_v42 = vmul.f32 %v5536_v41, %v5532_v28  ;;  %5234 = vmatprep.subr.mxu0 %v5566_v13 }
0x1ae0   :  { %5222 = vmatmul.mubr.msk.f32.vlgmr.msra.gmra.mrb[48].mxu1 %vm333_vm6, %v3414_v42 }
0x1ae1   :  { %5230 = vmatpush3.xpose.msk.msra.mxu1 %vm333_vm6, %v3653_v38  ;;  %5231 = vmatprep.mubr.msk.f32.mxu1 %vm5567_vm5, %v5566_v13 }
0x1ae2   :  { %5239 = vmatprep.subr.mxu1 %v5566_v13 }
0x1ae4   :  { %5232 = vmatmul.mubr.msk.f32.vlgmr.msra.gmra.mrb[50].mxu1 %vm333_vm6, %v3651_v43 }
0x1ae5   :  { %5241 = vmatprep.mubr.msk.f32.mxu1 %vm5567_vm5, %v5566_v13 }
0x1baf   :  { %v3487_v44 = vpop.f32.mrb[18].mxu0 }
0x1bb0   :  { %v5218_v45 = vpop.f32.mrb[19].mxu0  ;;  %5226 = vmatprep.mubr.msk.f32.mxu0 %vm333_vm6, %v3487_v44 }
0x1bb1   :  { %v4767_v45 = vld [vmem:[%s6413_s12 + $0x28] sm:$0xff] }
0x1bb3   :  { %v3563_v46 = vpop.f32.mrb[48].mxu1 }
0x1bb4   :  { %v5223_v47 = vpop.f32.mrb[49].mxu1  ;;  %5227 = vmatmul.mubr.msk.f32.vlgmr.msra.gmra.mrb[16].mxu0 %vm333_vm6, %v3563_v46 }
0x1bb5   :  { %5235 = vmatpush3.xpose.msk.msra.mxu0 %vm333_vm6, %v3731_v19  ;;  %5236 = vmatprep.mubr.msk.f32.mxu0 %vm5567_vm5, %v5566_v13  ;;  %v4768_v47 = vld [vmem:[%s6413_s12 + $0x30] sm:$0xff] }
0x1bb6   :  { %5244 = vmatprep.subr.mxu0 %v5566_v13 }
0x1bb7   :  { %v3724_v49 = vpop.f32.mrb[50].mxu1 }
0x1bb8   :  { %v3806_v54 = vmul.f32 0.35355338, %v3724_v49  ;;  %v5233_v56 = vpop.f32.mrb[51].mxu1  ;;  %5237 = vmatmul.mubr.msk.f32.vlgmr.msra.gmra.mrb[20].mxu0 %vm333_vm6, %v3729_v48  ;;  %v4769_v48 = vld [vmem:[%s6413_s12 + $0x38] sm:$0xff] }
0x1bb9   :  { %5246 = vmatprep.mubr.msk.f32.mxu0 %vm5567_vm5, %v5566_v13  ;;  %v5393_v49 = vpack.c.bf16 %v4769_v48, %v4768_v47 }
0x1bba   :  { %v3808_v57 = vadd.f32 %v3806_v54, %v5803_v20 }
0x1bbc   :  { %v3810_v59 = vsel %vm333_vm6, %v3808_v57, -inf }
0x1bbd   :  { %3811 = vmax.xlane.f32.xlu1 %v3810_v59 }
0x1c4a   :  { %v3812_v9 = vpop.xlane.xlu1 %3811 }
0x1c4b   :  { %v3816_v61 = vsub.f32 %v3808_v57, %v3812_v9 }
0x1c4d   :  { %v3818_v63 = vmul.f32 1.442695, %v3816_v61 }
0x1c4f   :  { %5537 = vpow2.f32 %v3818_v63  ;;  %v4765_v63 = vld [vmem:[%s6414_s11 + $0x2] sm:$0x3] }
0x1c59   :  { %v5538_v52 = vpop.eup %5537 }
0x1c5a   :  { %v3822_v50 = vsel %vm333_vm6, %v5538_v52, 0.0 }
0x1c8b   :  { %v3802_v0 = vpop.f32.mrb[20].mxu0 }
0x1c8c   :  { %v3807_v1 = vmul.f32 0.35355338, %v3802_v0  ;;  %v5238_v3 = vpop.f32.mrb[21].mxu0  ;;  %v4110_v0 = vrot.slane %v4765_v63, %v5745_v53 }
0x1c8e   :  { %v3809_v6 = vadd.f32 %v3807_v1, %v5807_v26 }
0x1c90   :  { %v3813_v7 = vsel %vm333_vm6, %v3809_v6, -inf }
0x1c91   :  { %3814 = vmax.xlane.f32.xlu0 %v3813_v7 }
0x1c95   :  { %3823 = vadd.xlane.f32.xlu0 %v3822_v50 }
0x1cab   :  { %3832 = vrot.lane.b32.xlu0 %v6086_v37, %s6449_s2 }
0x1d1e   :  { %v3815_v20 = vpop.xlane.xlu0 %3814 }
0x1d1f   :  { %v3817_v10 = vsub.f32 %v3809_v6, %v3815_v20 }
0x1d21   :  { %v3820_v58 = vmul.f32 1.442695, %v3817_v10 }
0x1d22   :  { %v3824_v8 = vpop.xlane.xlu0 %3823 }
0x1d23   :  { %5539 = vpow2.f32 %v3820_v58 }
0x1d24   :  { %5541 = vrcp.f32 %v3824_v8  ;;  %v4774_v8 = vld [vmem:[%s6415_s14 + $0x80] sm:$0xff] }
0x1d26   :  { %v3833_v11 = vpop.permute.xlu0 %3832 }
0x1d27   :  { %5240 = vmatpush3.msra.mxu1 %v3833_v11  ;;  %v4775_v11 = vld [vmem:[%s6415_s14 + $0x88] sm:$0xff] }
0x1d2d   :  { %v5540_v12 = vpop.eup %5539 }
0x1d2e   :  { %v5542_v26 = vpop.eup %5541  ;;  %v3825_v60 = vsel %vm333_vm6, %v5540_v12, 0.0 }
0x1d2f   :  { %v3830_v14 = vmul.f32 %v5542_v26, %v5538_v52  ;;  %3826 = vadd.xlane.f32.xlu1 %v3825_v60  ;;  %v4116_v52 = vrot.slane %v4765_v63, %v5751_v55  ;;  %v4776_v26 = vld [vmem:[%s6415_s14 + $0x90] sm:$0xff]  ;;  %v4777_v60 = vld [vmem:[%s6415_s14 + $0x98] sm:$0xff] }
0x1d31   :  { %5242 = vmatmul.mubr.msk.f32.vlgmr.msra.gmra.mrb[52].mxu1 %vm333_vm6, %v3830_v14  ;;  %v5401_v14 = vpack.c.bf16 %v4777_v60, %v4776_v26 }
0x1d40   :  { %3908 = vrot.lane.b32.xlu1 %v6084_v35, %s6449_s2 }
0x1dbc   :  { %v3827_v37 = vpop.xlane.xlu1 %3826 }
0x1dbd   :  { %5543 = vrcp.f32 %v3827_v37  ;;  %v4778_v37 = vld [vmem:[%s6415_s14 + $0xa0] sm:$0xff] }
0x1dc0   :  { %v3909_v18 = vpop.permute.xlu1 %3908 }
0x1dc1   :  { %5245 = vmatpush3.msra.mxu0 %v3909_v18 }
0x1dc2   :  { %5249 = vmatprep.subr.mxu0 %v4730_v16 }
0x1dc7   :  { %v5544_v21 = vpop.eup %5543 }
0x1dc8   :  { %v3831_v22 = vmul.f32 %v5544_v21, %v5540_v12  ;;  %v5397_v12 = vpack.c.bf16 %v4775_v11, %v4774_v8  ;;  %v4780_v21 = vld [vmem:[%s6415_s14 + $0xb0] sm:$0xff] }
0x1dca   :  { %5247 = vmatmul.mubr.msk.f32.vlgmr.msra.gmra.mrb[22].mxu0 %vm333_vm6, %v3831_v22  ;;  %v4781_v22 = vld [vmem:[%s6415_s14 + $0xb8] sm:$0xff] }
0x1dcb   :  { %5250 = vmatpush3.msra.mxu0 %v4730_v16  ;;  %v4779_v16 = vld [vmem:[%s6415_s14 + $0xa8] sm:$0xff] }
0x1dcc   :  { %5398 = vmatprep.subr.bf16.mxu0 %v5397_v12  ;;  %v5405_v18 = vpack.c.bf16 %v4779_v16, %v4778_v37 }
0x1e04   :  { %v3904_v23 = vpop.f32.mrb[52].mxu1 }
0x1e05   :  { %v5243_v24 = vpop.f32.mrb[53].mxu1  ;;  %5251 = vmatprep.mubr.msk.f32.mxu0 %vm333_vm6, %v3904_v23  ;;  %v5409_v23 = vpack.c.bf16 %v4781_v22, %v4780_v21  ;;  %v4794_v22 = vld [vmem:[%s6419_s3 + $0x1] ss:$0 sm:$0xff] }
0x1e06   :  { %v4782_v24 = vld [vmem:[%s6415_s14 + $0xc0] sm:$0xff]  ;;  %vm4388_vm8 = vcmp.eq.s32.totalorder %v4794_v22, %v5742_v51 }
0x1e9d   :  { %v3980_v25 = vpop.f32.mrb[22].mxu0 }
0x1e9e   :  { %v5248_v35 = vpop.f32.mrb[23].mxu0  ;;  %5252 = vmatmul.mubr.msk.f32.vlgmr.msra.gmra.mrb[16].mxu0 %vm333_vm6, %v3980_v25  ;;  %v4783_v25 = vld [vmem:[%s6415_s14 + $0xc8] sm:$0xff] }
0x1e9f   :  { %5400 = vmatpush3.bf16.msra.mxu0 %v5397_v12  ;;  %v4784_v35 = vld [vmem:[%s6415_s14 + $0xd0] sm:$0xff] }
0x1ea0   :  { %5402 = vmatprep.subr.bf16.mxu0 %v5401_v14 }
0x1ea3   :  { %5404 = vmatpush3.bf16.msra.mxu0 %v5401_v14 }
0x1ea4   :  { %5406 = vmatprep.subr.bf16.mxu0 %v5405_v18 }
0x1ea7   :  { %5408 = vmatpush3.bf16.msra.mxu0 %v5405_v18 }
0x1ea8   :  { %5410 = vmatprep.subr.bf16.mxu0 %v5409_v23 }
0x1eab   :  { %5412 = vmatpush3.bf16.msra.mxu0 %v5409_v23 }
0x1f71   :  { %v5253_v28 = vpop.f32.mrb[16].mxu0 }
0x1f72   :  { %v4076_v29 = vadd.f32 %v5253_v28, %v4764_v27  ;;  %v4056_v5 = vpop.f32.mrb[17].mxu0  ;;  %v4785_v28 = vld [vmem:[%s6415_s14 + $0xd8] sm:$0xff] }
0x1f73   :  { %v4075_v2 = vadd.f32 %v4764_v27, %v4056_v5  ;;  %v5413_v27 = vpack.c.bf16 %v4783_v25, %v4782_v24  ;;  %v4786_v5 = vld [vmem:[%s6415_s14 + $0xe0] sm:$0xff]  ;;  %v4796_v24 = vsel %vm4388_vm8, 1.0, %v5566_v13 }
0x1f74   :  { %v4078_v30 = vadd.f32 %v4076_v29, %v6073_v32  ;;  %v5417_v29 = vpack.c.bf16 %v4785_v28, %v4784_v35  ;;  %v4542_v35 = vsel %vm333_vm6, %v4796_v24, 0.0 }
0x1f75   :  { %v4077_v33 = vadd.f32 %v4075_v2, %v6070_v31  ;;  %v4766_v31 = vld [vmem:[%s6413_s12 + $0x20] sm:$0xff]  ;;  %5414 = vmatprep.subr.bf16.mxu0 %v5413_v27  ;;  %v4787_v2 = vld [vmem:[%s6415_s14 + $0xe8] sm:$0xff] }
0x1f76   :  { %v4084_v34 = vsel %vm182_vm4, %v4078_v30, 0.0  ;;  %v5389_v46 = vpack.c.bf16 %v4767_v45, %v4766_v31  ;;  %5416 = vmatpush3.bf16.msra.mxu0 %v5413_v27 }
0x1f77   :  { %4085 = vadd.xlane.f32.xlu0 %v4084_v34  ;;  %v4081_v36 = vsel %vm182_vm4, %v4077_v33, 0.0  ;;  %5418 = vmatprep.subr.bf16.mxu0 %v5417_v29  ;;  %v4789_v34 = vld [vmem:[%s6415_s14 + $0xf8] sm:$0xff] }
0x1f78   :  { %4082 = vadd.xlane.f32.xlu1 %v4081_v36  ;;  %5390 = vmatprep.subr.bf16.mxu1 %v5389_v46 }
0x1f79   :  { %5392 = vmatpush3.bf16.msra.mxu1 %v5389_v46 }
0x1f7a   :  { %5394 = vmatprep.subr.bf16.mxu1 %v5393_v49  ;;  %5420 = vmatpush3.bf16.msra.mxu0 %v5417_v29 }
0x1f7d   :  { %5396 = vmatpush3.bf16.msra.mxu1 %v5393_v49 }
0x1f7e   :  { %5300 = vmatprep.subr.mxu1 %v5566_v13 }
0x2004   :  { %v4086_v17 = vpop.xlane.xlu0 %4085 }
0x2005   :  { %v4088_v38 = vmul.f32 0.03125, %v4086_v17  ;;  %v4083_v39 = vpop.xlane.xlu1 %4082  ;;  %v4771_v17 = vld [vmem:[%s6416_s13 + $0x1] ss:$0 sm:$0xff] }
0x2006   :  { %v4087_v40 = vmul.f32 0.03125, %v4083_v39 }
0x2007   :  { %v4090_v41 = vsub.f32 %v4078_v30, %v4088_v38  ;;  %v5421_v30 = vpack.c.bf16 %v4787_v2, %v4786_v5 }
0x2008   :  { %v4089_v19 = vsub.f32 %v4077_v33, %v4087_v40  ;;  %v4788_v33 = vld [vmem:[%s6415_s14 + $0xf0] sm:$0xff] }
0x2009   :  { %v4092_v42 = vmul.f32 %v4090_v41, %v4090_v41  ;;  %5422 = vmatprep.subr.bf16.mxu0 %v5421_v30  ;;  %v5425_v36 = vpack.c.bf16 %v4789_v34, %v4788_v33 }
0x200a   :  { %v4091_v43 = vmul.f32 %v4089_v19, %v4089_v19  ;;  %5424 = vmatpush3.bf16.msra.mxu0 %v5421_v30 }
0x200b   :  { %v4096_v44 = vsel %vm182_vm4, %v4092_v42, 0.0  ;;  %5426 = vmatprep.subr.bf16.mxu0 %v5425_v36 }
0x200c   :  { %4097 = vadd.xlane.f32.xlu1 %v4096_v44  ;;  %v4093_v32 = vsel %vm182_vm4, %v4091_v43, 0.0 }
0x200d   :  { %4094 = vadd.xlane.f32.xlu0 %v4093_v32 }
0x200e   :  { %5428 = vmatpush3.bf16.msra.mxu0 %v5425_v36 }
0x2099   :  { %v4098_v54 = vpop.xlane.xlu1 %4097 }
0x209a   :  { %v4100_v56 = vmul.f32 0.03125, %v4098_v54  ;;  %v4095_v57 = vpop.xlane.xlu0 %4094 }
0x209b   :  { %v4099_v59 = vmul.f32 0.03125, %v4095_v57 }
0x209c   :  { %v4102_v9 = vadd.f32 1e-12, %v4100_v56 }
0x209d   :  { %v4101_v61 = vadd.f32 1e-12, %v4099_v59 }
0x209e   :  { %5545 = vrsqrt.f32 %v4102_v9 }
0x209f   :  { %5547 = vrsqrt.f32 %v4101_v61 }
0x20a8   :  { %v5546_v1 = vpop.eup %5545 }
0x20a9   :  { %v5548_v3 = vpop.eup %5547  ;;  %v4106_v6 = vmul.f32 %v5546_v1, %v4090_v41 }
0x20aa   :  { %v4105_v7 = vmul.f32 %v5548_v3, %v4089_v19 }
0x20ab   :  { %v4112_v50 = vmul.f32 %v4110_v0, %v4106_v6 }
0x20ac   :  { %v4111_v20 = vmul.f32 %v4110_v0, %v4105_v7  ;;  %v4791_v0 = vld [vmem:[%s6417_s15 + $0x1] ss:$0 sm:$0xff] }
0x20ad   :  { %v6279_v58 = vadd.f32 %v4116_v52, %v4112_v50 }
0x20ae   :  { %v6277_v10 = vadd.f32 %v4116_v52, %v4111_v20 }
0x20b0   :  { %5262 = vmatprep.mubr.msk.f32.mxu1 %vm182_vm4, %v6277_v10 }
0x20b1   :  { %5263 = vmatmul.mubr.msk.f32.vlgmr.msra.gmra.mrb[54].mxu1 %vm182_vm4, %v6279_v58 }
0x20b2   :  { %5302 = vmatprep.mubr.msk.f32.mxu1 %vm5567_vm5, %v5566_v13 }
0x2184   :  { %v5264_v38 = vpop.f32.mrb[54].mxu1 }
0x2185   :  { %v4210_v39 = vadd.f32 %v5264_v38, %v4771_v17  ;;  %v4204_v40 = vpop.f32.mrb[55].mxu1 }
0x2186   :  { %v4205_v41 = vadd.f32 %v4771_v17, %v4204_v40 }
0x2187   :  { %v4214_v19 = vmul.f32 %v4210_v39, %v4210_v39 }
0x2188   :  { %v4213_v42 = vmul.f32 %v4205_v41, %v4205_v41 }
0x2189   :  { %v4216_v43 = vmul.f32 %v4214_v19, %v4210_v39 }
0x218a   :  { %v4215_v44 = vmul.f32 %v4213_v42, %v4205_v41 }
0x218b   :  { %v4218_v32 = vmul.f32 0.044715, %v4216_v43  ;;  %v4571_v43 = vld [vmem:[%s6420_s17] sm:$0xff] }
0x218c   :  { %v4217_v31 = vmul.f32 0.044715, %v4215_v44  ;;  %v4572_v44 = vld [vmem:[%s6420_s17 + $0x8] sm:$0xff] }
0x218d   :  { %v4220_v45 = vadd.f32 %v4218_v32, %v4210_v39  ;;  %v5429_v32 = vpack.c.bf16 %v4572_v44, %v4571_v43 }
0x218e   :  { %v4219_v46 = vadd.f32 %v4217_v31, %v4205_v41 }
0x218f   :  { %v4222_v47 = vmul.f32 0.7978846, %v4220_v45  ;;  %v5563_v45 = vld [vmem:[%s6410_s1 + $0x1] ss:$0 sm:$0xff] }
0x2190   :  { %v4221_v48 = vmul.f32 0.7978846, %v4219_v46  ;;  %v4564_v46 = vmul.f32 %v5563_v45, %v4796_v24 }
0x2191   :  { %5549 = vtanh.f32 %v4222_v47 }
0x2192   :  { %5551 = vtanh.f32 %v4221_v48  ;;  %v4568_v48 = vsel %vm333_vm6, %v4564_v46, -inf }
0x219b   :  { %v5550_v49 = vpop.eup %5549 }
0x219c   :  { %v5552_v54 = vpop.eup %5551  ;;  %v4226_v56 = vadd.f32 1.0, %v5550_v49 }
0x219d   :  { %v4225_v57 = vadd.f32 1.0, %v5552_v54 }
0x219e   :  { %v4228_v59 = vmul.f32 0.5, %v4226_v56 }
0x219f   :  { %v4227_v9 = vmul.f32 0.5, %v4225_v57 }
0x21a0   :  { %v4230_v63 = vmul.f32 %v4228_v59, %v4210_v39 }
0x21a1   :  { %v4229_v61 = vmul.f32 %v4227_v9, %v4205_v41 }
0x21a3   :  { %5297 = vmatprep.mubr.f32.mxu0 %v4229_v61 }
0x21a4   :  { %5298 = vmatmul.mubr.f32.vlgmr.msra.gmra.mrb[24].mxu0 %v4230_v63 }
0x2277   :  { %v5299_v1 = vpop.f32.mrb[24].mxu0 }
0x2278   :  { %v4328_v3 = vadd.f32 %v5299_v1, %v4791_v0  ;;  %v4322_v6 = vpop.f32.mrb[25].mxu0 }
0x2279   :  { %v4323_v7 = vadd.f32 %v4791_v0, %v4322_v6 }
0x227a   :  { %v4332_v52 = vadd.f32 %v4328_v3, %v6279_v58 }
0x227b   :  { %v4331_v50 = vadd.f32 %v4323_v7, %v6277_v10  ;;  %v4793_v10 = vld [vmem:[%s6419_s3] ss:$0 sm:$0xff] }
0x227c   :  { %v4338_v20 = vsel %vm182_vm4, %v4332_v52, 0.0  ;;  %vm4387_vm7 = vcmp.eq.s32.totalorder %v4793_v10, %v5742_v51  ;;  %v4792_v51 = vld [vmem:[%s6418_s16 + $0x2] sm:$0x3] }
0x227d   :  { %4339 = vadd.xlane.f32.xlu1 %v4338_v20  ;;  %v4335_v8 = vsel %vm182_vm4, %v4331_v50, 0.0  ;;  %v4795_v23 = vsel %vm4387_vm7, 1.0, %v5566_v13  ;;  %v4364_v33 = vrot.slane %v4792_v51, %v5745_v53  ;;  %v4370_v39 = vrot.slane %v4792_v51, %v5751_v55  ;;  %v4573_v55 = vld [vmem:[%s6420_s17 + $0x10] sm:$0xff] }
0x227e   :  { %4336 = vadd.xlane.f32.xlu0 %v4335_v8  ;;  %v4539_v25 = vsel %vm333_vm6, %v4795_v23, 0.0 }
0x230a   :  { %v4340_v11 = vpop.xlane.xlu1 %4339 }
0x230b   :  { %v4342_v12 = vmul.f32 0.03125, %v4340_v11  ;;  %v4337_v26 = vpop.xlane.xlu0 %4336 }
0x230c   :  { %v4341_v60 = vmul.f32 0.03125, %v4337_v26 }
0x230d   :  { %v4344_v14 = vsub.f32 %v4332_v52, %v4342_v12 }
0x230e   :  { %v4343_v37 = vsub.f32 %v4331_v50, %v4341_v60  ;;  %v4799_v50 = vld [vmem:[%s6421_s18] ss:$0 sm:$0xff] }
0x230f   :  { %v4346_v16 = vmul.f32 %v4344_v14, %v4344_v14 }
0x2310   :  { %v4345_v18 = vmul.f32 %v4343_v37, %v4343_v37 }
0x2311   :  { %v4350_v21 = vsel %vm182_vm4, %v4346_v16, 0.0 }
0x2312   :  { %4351 = vadd.xlane.f32.xlu1 %v4350_v21  ;;  %v4347_v58 = vsel %vm182_vm4, %v4345_v18, 0.0 }
0x2313   :  { %4348 = vadd.xlane.f32.xlu0 %v4347_v58 }
0x2316   :  { %4543 = vadd.xlane.f32.xlu1 %v4542_v35 }
0x2317   :  { %4540 = vadd.xlane.f32.xlu0 %v4539_v25 }
0x231a   :  { %4569 = vmax.xlane.f32.xlu1 %v4568_v48 }
0x239f   :  { %v4352_v27 = vpop.xlane.xlu1 %4351 }
0x23a0   :  { %v4354_v28 = vmul.f32 0.03125, %v4352_v27  ;;  %v4349_v29 = vpop.xlane.xlu0 %4348 }
0x23a1   :  { %v4353_v5 = vmul.f32 0.03125, %v4349_v29 }
0x23a2   :  { %v4356_v2 = vadd.f32 1e-12, %v4354_v28 }
0x23a3   :  { %v4355_v30 = vadd.f32 1e-12, %v4353_v5  ;;  %v4544_v57 = vpop.xlane.xlu1 %4543 }
0x23a4   :  { %5553 = vrsqrt.f32 %v4356_v2  ;;  %v4541_v54 = vpop.xlane.xlu0 %4540  ;;  %v4546_v59 = vmax.f32 %v4544_v57, 1.0 }
0x23a5   :  { %5555 = vrsqrt.f32 %v4355_v30  ;;  %v4545_v56 = vmax.f32 %v4541_v54, 1.0 }
0x23a7   :  { %5557 = vrcp.f32 %v4545_v56  ;;  %v4570_v52 = vpop.xlane.xlu1 %4569 }
0x23a8   :  { %5559 = vrcp.f32 %v4546_v59  ;;  %v4665_v11 = vsel %vm4663_vm9, %v4570_v52, 0.0 }
0x23ae   :  { %v5554_v34 = vpop.eup %5553 }
0x23af   :  { %v5556_v36 = vpop.eup %5555  ;;  %v4360_v17 = vmul.f32 %v5554_v34, %v4344_v14 }
0x23b0   :  { %v4359_v38 = vmul.f32 %v5556_v36, %v4343_v37 }
0x23b1   :  { %v4366_v40 = vmul.f32 %v4364_v33, %v4360_v17  ;;  %v5558_v9 = vpop.eup %5557 }
0x23b2   :  { %v4365_v41 = vmul.f32 %v4364_v33, %v4359_v38  ;;  %v5560_v1 = vpop.eup %5559 }
0x23b3   :  { %v4372_v42 = vadd.f32 %v4370_v39, %v4366_v40 }
0x23b4   :  { %v4371_v19 = vadd.f32 %v4370_v39, %v4365_v41 }
0x23b5   :  { %v4374_v31 = vmul.f32 %v4372_v42, %v5762_v4 }
0x23b6   :  { %v4373_v53 = vmul.f32 %v4371_v19, %v5755_v62  ;;  %v4574_v62 = vld [vmem:[%s6420_s17 + $0x18] sm:$0xff] }
0x23b7   :  { %v5433_v4 = vpack.c.bf16 %v4574_v62, %v4573_v55 }
0x23b8   :  { %5301 = vmatpush3.msra.mxu1 %v4373_v53 }
0x23b9   :  { %5305 = vmatprep.subr.mxu1 %v5566_v13  ;;  %5303 = vmatmul.mubr.msk.f32.vlgmr.msra.gmra.mrb[56].mxu1 %vm333_vm6, %v4795_v23 }
0x23ba   :  { %5306 = vmatpush3.msra.mxu1 %v4374_v31  ;;  %5307 = vmatprep.mubr.msk.f32.mxu1 %vm5567_vm5, %v5566_v13  ;;  %v5564_v13 = vld [vmem:[%s6410_s1] ss:$0 sm:$0xff] }
0x23bb   :  { %5430 = vmatprep.subr.bf16.mxu1 %v5429_v32  ;;  %v4563_v47 = vmul.f32 %v5564_v13, %v4795_v23 }
0x23bd   :  { %5308 = vmatmul.mubr.msk.f32.vlgmr.msra.gmra.mrb[58].mxu1 %vm333_vm6, %v4796_v24  ;;  %v4565_v49 = vsel %vm333_vm6, %v4563_v47, -inf }
0x23be   :  { %5432 = vmatpush3.bf16.msra.mxu1 %v5429_v32  ;;  %4566 = vmax.xlane.f32.xlu0 %v4565_v49 }
0x23bf   :  { %5434 = vmatprep.subr.bf16.mxu1 %v5433_v4 }
0x23c2   :  { %5436 = vmatpush3.bf16.msra.mxu1 %v5433_v4 }
0x244b   :  { %v4567_v20 = vpop.xlane.xlu0 %4566 }
0x244c   :  { %v4664_v60 = vsel %vm4663_vm9, %v4567_v20, 0.0 }
0x248c   :  { %v4462_v61 = vpop.f32.mrb[56].mxu1 }
0x248d   :  { %v4548_v63 = vmul.f32 %v5558_v9, %v4462_v61  ;;  %v5304_v0 = vpop.f32.mrb[57].mxu1 }
0x248f   :  { %5318 = vmatprep.mubr.msk.f32.mxu1 %vm182_vm4, %v4548_v63 }
0x2490   :  { %v4535_v3 = vpop.f32.mrb[58].mxu1 }
0x2491   :  { %v4550_v6 = vmul.f32 %v5560_v1, %v4535_v3  ;;  %v5309_v7 = vpop.f32.mrb[59].mxu1 }
0x2493   :  { %5319 = vmatmul.mubr.msk.f32.vlgmr.msra.gmra.mrb[60].mxu1 %vm182_vm4, %v4550_v6 }
0x2566   :  { %v5320_v8 = vpop.f32.mrb[60].mxu1 }
0x2567   :  { %v4660_v12 = vadd.f32 %v5320_v8, %v4799_v50  ;;  %v4654_v26 = vpop.f32.mrb[61].mxu1 }
0x2568   :  { %v4655_v14 = vadd.f32 %v4799_v50, %v4654_v26 }
0x2569   :  { %v4667_v37 = vadd.f32 %v4665_v11, %v4660_v12 }
0x256a   :  { %v4666_v16 = vadd.f32 %v4664_v60, %v4655_v14 }
0x256b   :  { %4669 = vst [vmem:[%s6422_s19 + $0x8] sm:$0xff] %v4667_v37 }
0x256c   :  { %4668 = vst [vmem:[%s6422_s19] sm:$0xff] %v4666_v16 }

</bundles_post_ra>
